<compile_context>
chip_gen: v6e
topology: v6e:2x2x1
jax: 0.10.0
libtpu: 0.0.40
codegen_flags: <defaults>
</compile_context>

<pallas_src>
import functools

import numpy as np
import jax
import jax.numpy as jnp
from jax import lax
from jax.experimental import pallas as pl
from jax.experimental.pallas import tpu as pltpu

SOBEL_X = ((-1.0, 0.0, 1.0), (-2.0, 0.0, 2.0), (-1.0, 0.0, 1.0))
ALPHA_CHANNEL = 3      # hard-coded in the PyTorch module (x[:, 3:4, :, :])
ALIVE_THRESHOLD = 0.1  # must stay > 0 (see semantics note above)


def growing_ca_kernel(xf_ref, mask_ref, w1_ref, b1_ref, w2_ref, out_ref,
                      *, H, W, mm_dtype):
    """One batch element per grid step.

    xf_ref  : (1, C, XL)   zero-padded image, spatial fused into lanes;
              XL = (H+5)*(W+4) (2 pad rows/cols on each side + 1 extra zero row
              so every shifted slice stays in bounds).
    mask_ref: (1, FL)      1.0 on interior pixels of the singly-padded frame.
    w1_ref  : (Hid, 3C)    first 1x1 conv weight, columns grouped [id|sx|sy].
    b1_ref  : (Hid, 1)
    w2_ref  : (C, Hid)     second 1x1 conv weight (bias-free).
    out_ref : (1, C, OUTL) OUTL = H*(W+4); the last 4 columns of each fused row
              are junk and dropped by the wrapper.
    """
    Wp4 = W + 4
    FL = (H + 2) * Wp4 + 2          # fused length of the singly-padded frame (+2 slack)
    OUTL = H * Wp4

    def tap(di, dj, length=FL):
        # padded image shifted by (di, dj): a contiguous static lane slice.
        s = di * Wp4 + dj
        return xf_ref[0, :, s:s + length]

    # ---- perception: identity + separable sobel (shared blurs) -------------
    x1 = tap(1, 1)                                                # (C, FL)
    # sobel_x = [1,2,1]^T rows x [-1,0,1] cols: one vertical blur, two lane shifts.
    vb = tap(0, 0, FL + 2) + 2.0 * tap(1, 0, FL + 2) + tap(2, 0, FL + 2)
    sx = vb[:, 2:FL + 2] - vb[:, 0:FL]
    # sobel_y = [-1,0,1]^T rows x [1,2,1] cols: one horizontal blur, two row shifts.
    hb = (tap(0, 0, FL + 2 * Wp4) + 2.0 * tap(0, 1, FL + 2 * Wp4)
          + tap(0, 2, FL + 2 * Wp4))
    sy = hb[:, 2 * Wp4:2 * Wp4 + FL] - hb[:, 0:FL]

    # ---- fused update: (Hid,3C)@(3C,Npix) -> ReLU -> (C,Hid)@(Hid,Npix) -----
    p = jnp.concatenate([x1, sx, sy], axis=0).astype(mm_dtype)    # (3C, FL), sublane stack
    h = jnp.dot(w1_ref[...], p, preferred_element_type=jnp.float32) + b1_ref[...]
    h = jnp.maximum(h, 0.0)
    dx = jnp.dot(w2_ref[...], h.astype(mm_dtype),
                 preferred_element_type=jnp.float32)              # (C, FL)
    x_new = x1 + dx

    # ---- alive masks: separable 3x3 maxpool of alpha, threshold > 0.1 ------
    def pool3x3(a):   # a: (1, FL), zeros outside the frame interior
        rmax = jnp.maximum(jnp.maximum(a[:, 0:OUTL + 2],
                                       a[:, Wp4:Wp4 + OUTL + 2]),
                           a[:, 2 * Wp4:2 * Wp4 + OUTL + 2])
        return jnp.maximum(jnp.maximum(rmax[:, 0:OUTL],
                                       rmax[:, 1:OUTL + 1]),
                           rmax[:, 2:OUTL + 2])                   # (1, OUTL)

    # Pre-update alpha already has a true zero halo (it is the padded input);
    # post-update alpha gets its halo/junk columns zeroed with the mask input.
    a_pre = xf_ref[0, ALPHA_CHANNEL:ALPHA_CHANNEL + 1, Wp4 + 1:Wp4 + 1 + FL]
    a_post = x_new[ALPHA_CHANNEL:ALPHA_CHANNEL + 1, :] * mask_ref[...]
    alive = jnp.logical_and(pool3x3(a_pre) > ALIVE_THRESHOLD,
                            pool3x3(a_post) > ALIVE_THRESHOLD)    # (1, OUTL)

    # ---- dense lane write-back ---------------------------------------------
    out_ref[0, :, :] = x_new[:, Wp4 + 1:Wp4 + 1 + OUTL] * alive.astype(jnp.float32)


def growing_ca_forward(x_nchw, w1, b1, w2, *, mm_dtype=jnp.float32):
    """Forward pass matching GrowingCA.forward (NCHW in, NCHW out).

    x_nchw : (B, C, H, W) float32
    w1     : (Hid, 3C) first 1x1 conv weight, input channels in PyTorch's
             interleaved order (channel 3c+k = filter k applied to grid chan c)
    b1     : (Hid,)
    w2     : (C, Hid)  second 1x1 conv weight (bias-free)
    mm_dtype: matmul operand dtype.  float32 keeps exact parity with the f32
             module (incl. the >0.1 alive decisions); jnp.bfloat16 gives ~3x
             MXU throughput on v6e/v7x and halves p/h VMEM, at ~1e-2 relative
             error (the kernel is DMA/VPU-bound at C=16, so f32 is the default).
    """
    B, C, H, W = x_nchw.shape
    Hid, k3c = w1.shape
    assert k3c == 3 * C
    assert C > ALPHA_CHANNEL, "GrowingCA needs >= 4 channels (alpha = channel 3)"
    assert ALIVE_THRESHOLD > 0.0, "zero-pad maxpool trick requires a positive threshold"

    Wp4 = W + 4
    FL = (H + 2) * Wp4 + 2
    OUTL = H * Wp4
    XL = (H + 5) * Wp4      # rows padded (2, 3): the extra zero row is slice slack

    xf = jnp.pad(x_nchw.astype(jnp.float32),
                 ((0, 0), (0, 0), (2, 3), (2, 2))).reshape(B, C, XL)

    # 1.0 on interior pixels of the singly-padded frame, 0.0 on halo / junk.
    m2 = jnp.zeros((H + 2, Wp4), jnp.float32).at[1:H + 1, 1:W + 1].set(1.0)
    mask = jnp.pad(m2.reshape(1, (H + 2) * Wp4), ((0, 0), (0, 2)))   # (1, FL)

    # Regroup w1's interleaved [id, sx, sy]*C input channels into contiguous
    # [id-block | sx-block | sy-block] to match the kernel's stacked-P layout.
    w1_k = jnp.concatenate([w1[:, 0::3], w1[:, 1::3], w1[:, 2::3]],
                           axis=1).astype(mm_dtype)                  # (Hid, 3C)
    b1_k = b1.reshape(Hid, 1).astype(jnp.float32)
    w2_k = w2.astype(mm_dtype)                                       # (C, Hid)

    kernel = functools.partial(growing_ca_kernel, H=H, W=W, mm_dtype=mm_dtype)
    out = pl.pallas_call(
        kernel,
        out_shape=jax.ShapeDtypeStruct((B, C, OUTL), jnp.float32),
        grid_spec=pltpu.PrefetchScalarGridSpec(
            num_scalar_prefetch=0,
            grid=(B,),
            in_specs=[
                pl.BlockSpec((1, C, XL), lambda b: (b, 0, 0)),
                pl.BlockSpec((1, FL), lambda b: (0, 0)),
                pl.BlockSpec((Hid, 3 * C), lambda b: (0, 0)),
                pl.BlockSpec((Hid, 1), lambda b: (0, 0)),
                pl.BlockSpec((C, Hid), lambda b: (0, 0)),
            ],
            out_specs=pl.BlockSpec((1, C, OUTL), lambda b: (b, 0, 0)),
        ),
        compiler_params=pltpu.CompilerParams(
            dimension_semantics=("parallel",)),
    )(xf, mask, w1_k, b1_k, w2_k)

    # Drop the 4 junk columns of each fused row; output is already NCHW.
    return out.reshape(B, C, H, Wp4)[:, :, :, :W]


def reference_forward(x, w1, b1, w2):
    """Pure-JAX NCHW reference mirroring the PyTorch module exactly."""
    B, C, H, W = x.shape
    identity = jnp.zeros((3, 3), jnp.float32).at[1, 1].set(1.0)
    sob = jnp.array(SOBEL_X, jnp.float32)
    filt = jnp.stack([identity, sob, sob.T])                         # (3, 3, 3)
    filt = jnp.tile(filt, (C, 1, 1))[:, None]                        # (3C, 1, 3, 3)

    def alive_mask(t):
        a = t[:, 3:4]
        pooled = lax.reduce_window(a, -jnp.inf, lax.max, (1, 1, 3, 3),
                                   (1, 1, 1, 1),
                                   padding=((0, 0), (0, 0), (1, 1), (1, 1)))
        return pooled > ALIVE_THRESHOLD

    pre = alive_mask(x)
    p = lax.conv_general_dilated(x, filt, (1, 1), ((1, 1), (1, 1)),
                                 dimension_numbers=('NCHW', 'OIHW', 'NCHW'),
                                 feature_group_count=C)
    hidden = jnp.einsum('bchw,oc->bohw', p, w1) + b1[None, :, None, None]
    hidden = jnp.maximum(hidden, 0.0)
    dx = jnp.einsum('bchw,oc->bohw', hidden, w2)
    xn = x + dx
    post = alive_mask(xn)
    alive = jnp.logical_and(pre, post).astype(jnp.float32)
    return xn * alive


if __name__ == "__main__":
    B, C, H, W, HID = 2, 16, 16, 16, 128   # n_channels=16, hidden_channels=128

    key = jax.random.PRNGKey(0)
    k1, k2, k3, k4 = jax.random.split(key, 4)
    x = jax.random.normal(k1, (B, C, H, W), jnp.float32)
    w1 = jax.random.normal(k2, (HID, 3 * C), jnp.float32) * 0.1
    b1 = jax.random.normal(k3, (HID,), jnp.float32) * 0.1
    # NOTE: the PyTorch module zero-inits the second conv weight; small random
    # values are used so the second matmul and post-update mask are exercised.
    w2 = jax.random.normal(k4, (C, HID), jnp.float32) * 0.1

    out = jax.jit(growing_ca_forward)(x, w1, b1, w2)
    jax.block_until_ready(out)

    ref = reference_forward(x, w1, b1, w2)
    np.testing.assert_allclose(np.asarray(out), np.asarray(ref),
                               rtol=1e-4, atol=1e-4)
    print("KERNEL_OK")
</pallas_src>

<mosaic_0001>
module attributes {stable_mosaic.version = 11 : i64} {
  func.func @growing_ca_kernel(%arg0: i32, %arg1: memref<1x16x420xf32, #tpu.memory_space<vmem>>, %arg2: memref<1x362xf32, #tpu.memory_space<vmem>>, %arg3: memref<128x48xf32, #tpu.memory_space<vmem>>, %arg4: memref<128x1xf32, #tpu.memory_space<vmem>>, %arg5: memref<16x128xf32, #tpu.memory_space<vmem>>, %arg6: memref<1x16x320xf32, #tpu.memory_space<vmem>>) attributes {dimension_semantics = [#tpu.dimension_semantics<parallel>], iteration_bounds = array<i64: 2>, scalar_prefetch = 0 : i64, scratch_operands = 0 : i64, tpu.core_type = #tpu.core_type<tc>, window_params = [{transform_indices = @transform_0, window_bounds = array<i64: 1, 16, 420>}, {pipeline_mode = #tpu.pipeline_mode<synchronous>, transform_indices = @transform_1, window_bounds = array<i64: 1, 362>}, {pipeline_mode = #tpu.pipeline_mode<synchronous>, transform_indices = @transform_2, window_bounds = array<i64: 128, 48>}, {pipeline_mode = #tpu.pipeline_mode<synchronous>, transform_indices = @transform_3, window_bounds = array<i64: 128, 1>}, {pipeline_mode = #tpu.pipeline_mode<synchronous>, transform_indices = @transform_4, window_bounds = array<i64: 16, 128>}, {transform_indices = @transform_5, window_bounds = array<i64: 1, 16, 320>}]} {
    %c0 = arith.constant 0 : index
    %c0_0 = arith.constant 0 : index
    %c21 = arith.constant 21 : index
    %0 = vector.load %arg1[%c0, %c0_0, %c21] : memref<1x16x420xf32, #tpu.memory_space<vmem>>, vector<1x16x362xf32>
    %1 = vector.shape_cast %0 : vector<1x16x362xf32> to vector<16x362xf32>
    %c0_1 = arith.constant 0 : index
    %c0_2 = arith.constant 0 : index
    %c0_3 = arith.constant 0 : index
    %2 = vector.load %arg1[%c0_1, %c0_2, %c0_3] : memref<1x16x420xf32, #tpu.memory_space<vmem>>, vector<1x16x364xf32>
    %3 = vector.shape_cast %2 : vector<1x16x364xf32> to vector<16x364xf32>
    %c0_4 = arith.constant 0 : index
    %c0_5 = arith.constant 0 : index
    %c20 = arith.constant 20 : index
    %4 = vector.load %arg1[%c0_4, %c0_5, %c20] : memref<1x16x420xf32, #tpu.memory_space<vmem>>, vector<1x16x364xf32>
    %5 = vector.shape_cast %4 : vector<1x16x364xf32> to vector<16x364xf32>
    %cst = arith.constant 2.000000e+00 : f32
    %6 = vector.broadcast %cst : f32 to vector<16x364xf32>
    %7 = arith.mulf %6, %5 : vector<16x364xf32>
    %8 = arith.addf %3, %7 : vector<16x364xf32>
    %c0_6 = arith.constant 0 : index
    %c0_7 = arith.constant 0 : index
    %c40 = arith.constant 40 : index
    %9 = vector.load %arg1[%c0_6, %c0_7, %c40] : memref<1x16x420xf32, #tpu.memory_space<vmem>>, vector<1x16x364xf32>
    %10 = vector.shape_cast %9 : vector<1x16x364xf32> to vector<16x364xf32>
    %11 = arith.addf %8, %10 : vector<16x364xf32>
    %12 = vector.extract_strided_slice %11 {offsets = [0, 2], sizes = [16, 362], strides = [1, 1]} : vector<16x364xf32> to vector<16x362xf32>
    %13 = vector.extract_strided_slice %11 {offsets = [0, 0], sizes = [16, 362], strides = [1, 1]} : vector<16x364xf32> to vector<16x362xf32>
    %14 = arith.subf %12, %13 : vector<16x362xf32>
    %c0_8 = arith.constant 0 : index
    %c0_9 = arith.constant 0 : index
    %c0_10 = arith.constant 0 : index
    %15 = vector.load %arg1[%c0_8, %c0_9, %c0_10] : memref<1x16x420xf32, #tpu.memory_space<vmem>>, vector<1x16x402xf32>
    %16 = vector.shape_cast %15 : vector<1x16x402xf32> to vector<16x402xf32>
    %c0_11 = arith.constant 0 : index
    %c0_12 = arith.constant 0 : index
    %c1 = arith.constant 1 : index
    %17 = vector.load %arg1[%c0_11, %c0_12, %c1] : memref<1x16x420xf32, #tpu.memory_space<vmem>>, vector<1x16x402xf32>
    %18 = vector.shape_cast %17 : vector<1x16x402xf32> to vector<16x402xf32>
    %cst_13 = arith.constant 2.000000e+00 : f32
    %19 = vector.broadcast %cst_13 : f32 to vector<16x402xf32>
    %20 = arith.mulf %19, %18 : vector<16x402xf32>
    %21 = arith.addf %16, %20 : vector<16x402xf32>
    %c0_14 = arith.constant 0 : index
    %c0_15 = arith.constant 0 : index
    %c2 = arith.constant 2 : index
    %22 = vector.load %arg1[%c0_14, %c0_15, %c2] : memref<1x16x420xf32, #tpu.memory_space<vmem>>, vector<1x16x402xf32>
    %23 = vector.shape_cast %22 : vector<1x16x402xf32> to vector<16x402xf32>
    %24 = arith.addf %21, %23 : vector<16x402xf32>
    %25 = vector.extract_strided_slice %24 {offsets = [0, 40], sizes = [16, 362], strides = [1, 1]} : vector<16x402xf32> to vector<16x362xf32>
    %26 = vector.extract_strided_slice %24 {offsets = [0, 0], sizes = [16, 362], strides = [1, 1]} : vector<16x402xf32> to vector<16x362xf32>
    %27 = arith.subf %25, %26 : vector<16x362xf32>
    %28 = tpu.concatenate %1, %14, %27 in 0 : vector<16x362xf32>, vector<16x362xf32>, vector<16x362xf32> -> vector<48x362xf32>
    %c0_16 = arith.constant 0 : index
    %c0_17 = arith.constant 0 : index
    %29 = vector.load %arg3[%c0_16, %c0_17] : memref<128x48xf32, #tpu.memory_space<vmem>>, vector<128x48xf32>
    %cst_18 = arith.constant dense<0.000000e+00> : vector<128x362xf32>
    %30 = tpu.matmul %29, %28, %cst_18 {dimension_numbers = #tpu.dot_dimension_numbers<[1], [0], [0], [1], [0, 0, 1, 1], [], []>} : vector<128x48xf32>, vector<48x362xf32>, vector<128x362xf32> -> vector<128x362xf32>
    %c0_19 = arith.constant 0 : index
    %c0_20 = arith.constant 0 : index
    %31 = vector.load %arg4[%c0_19, %c0_20] : memref<128x1xf32, #tpu.memory_space<vmem>>, vector<128x1xf32>
    %32 = vector.broadcast %31 : vector<128x1xf32> to vector<128x362xf32>
    %33 = arith.addf %30, %32 : vector<128x362xf32>
    %cst_21 = arith.constant 0.000000e+00 : f32
    %34 = vector.broadcast %cst_21 : f32 to vector<128x362xf32>
    %35 = arith.maximumf %33, %34 : vector<128x362xf32>
    %c0_22 = arith.constant 0 : index
    %c0_23 = arith.constant 0 : index
    %36 = vector.load %arg5[%c0_22, %c0_23] : memref<16x128xf32, #tpu.memory_space<vmem>>, vector<16x128xf32>
    %cst_24 = arith.constant dense<0.000000e+00> : vector<16x362xf32>
    %37 = tpu.matmul %36, %35, %cst_24 {dimension_numbers = #tpu.dot_dimension_numbers<[1], [0], [0], [1], [0, 0, 1, 1], [], []>} : vector<16x128xf32>, vector<128x362xf32>, vector<16x362xf32> -> vector<16x362xf32>
    %38 = arith.addf %1, %37 : vector<16x362xf32>
    %c0_25 = arith.constant 0 : index
    %c3 = arith.constant 3 : index
    %c21_26 = arith.constant 21 : index
    %39 = vector.load %arg1[%c0_25, %c3, %c21_26] : memref<1x16x420xf32, #tpu.memory_space<vmem>>, vector<1x1x362xf32>
    %40 = vector.shape_cast %39 : vector<1x1x362xf32> to vector<1x362xf32>
    %41 = vector.extract_strided_slice %38 {offsets = [3, 0], sizes = [1, 362], strides = [1, 1]} : vector<16x362xf32> to vector<1x362xf32>
    %c0_27 = arith.constant 0 : index
    %c0_28 = arith.constant 0 : index
    %42 = vector.load %arg2[%c0_27, %c0_28] : memref<1x362xf32, #tpu.memory_space<vmem>>, vector<1x362xf32>
    %43 = arith.mulf %41, %42 : vector<1x362xf32>
    %44 = vector.extract_strided_slice %40 {offsets = [0, 0], sizes = [1, 322], strides = [1, 1]} : vector<1x362xf32> to vector<1x322xf32>
    %45 = vector.extract_strided_slice %40 {offsets = [0, 20], sizes = [1, 322], strides = [1, 1]} : vector<1x362xf32> to vector<1x322xf32>
    %46 = arith.maximumf %44, %45 : vector<1x322xf32>
    %47 = vector.extract_strided_slice %40 {offsets = [0, 40], sizes = [1, 322], strides = [1, 1]} : vector<1x362xf32> to vector<1x322xf32>
    %48 = arith.maximumf %46, %47 : vector<1x322xf32>
    %49 = vector.extract_strided_slice %48 {offsets = [0, 0], sizes = [1, 320], strides = [1, 1]} : vector<1x322xf32> to vector<1x320xf32>
    %50 = vector.extract_strided_slice %48 {offsets = [0, 1], sizes = [1, 320], strides = [1, 1]} : vector<1x322xf32> to vector<1x320xf32>
    %51 = arith.maximumf %49, %50 : vector<1x320xf32>
    %52 = vector.extract_strided_slice %48 {offsets = [0, 2], sizes = [1, 320], strides = [1, 1]} : vector<1x322xf32> to vector<1x320xf32>
    %53 = arith.maximumf %51, %52 : vector<1x320xf32>
    %cst_29 = arith.constant 1.000000e-01 : f32
    %54 = vector.broadcast %cst_29 : f32 to vector<1x320xf32>
    %55 = arith.cmpf ogt, %53, %54 : vector<1x320xf32>
    %56 = vector.extract_strided_slice %43 {offsets = [0, 0], sizes = [1, 322], strides = [1, 1]} : vector<1x362xf32> to vector<1x322xf32>
    %57 = vector.extract_strided_slice %43 {offsets = [0, 20], sizes = [1, 322], strides = [1, 1]} : vector<1x362xf32> to vector<1x322xf32>
    %58 = arith.maximumf %56, %57 : vector<1x322xf32>
    %59 = vector.extract_strided_slice %43 {offsets = [0, 40], sizes = [1, 322], strides = [1, 1]} : vector<1x362xf32> to vector<1x322xf32>
    %60 = arith.maximumf %58, %59 : vector<1x322xf32>
    %61 = vector.extract_strided_slice %60 {offsets = [0, 0], sizes = [1, 320], strides = [1, 1]} : vector<1x322xf32> to vector<1x320xf32>
    %62 = vector.extract_strided_slice %60 {offsets = [0, 1], sizes = [1, 320], strides = [1, 1]} : vector<1x322xf32> to vector<1x320xf32>
    %63 = arith.maximumf %61, %62 : vector<1x320xf32>
    %64 = vector.extract_strided_slice %60 {offsets = [0, 2], sizes = [1, 320], strides = [1, 1]} : vector<1x322xf32> to vector<1x320xf32>
    %65 = arith.maximumf %63, %64 : vector<1x320xf32>
    %cst_30 = arith.constant 1.000000e-01 : f32
    %66 = vector.broadcast %cst_30 : f32 to vector<1x320xf32>
    %67 = arith.cmpf ogt, %65, %66 : vector<1x320xf32>
    %68 = arith.andi %55, %67 : vector<1x320xi1>
    %69 = vector.extract_strided_slice %38 {offsets = [0, 21], sizes = [16, 320], strides = [1, 1]} : vector<16x362xf32> to vector<16x320xf32>
    %70 = arith.extui %68 : vector<1x320xi1> to vector<1x320xi32>
    %71 = arith.sitofp %70 : vector<1x320xi32> to vector<1x320xf32>
    %72 = vector.broadcast %71 : vector<1x320xf32> to vector<16x320xf32>
    %73 = arith.mulf %69, %72 : vector<16x320xf32>
    %c0_31 = arith.constant 0 : index
    %c0_32 = arith.constant 0 : index
    %c0_33 = arith.constant 0 : index
    %74 = vector.load %arg6[%c0_31, %c0_32, %c0_33] : memref<1x16x320xf32, #tpu.memory_space<vmem>>, vector<1x16x320xf32>
    %75 = vector.shape_cast %74 : vector<1x16x320xf32> to vector<16x320xf32>
    %76 = vector.shape_cast %73 : vector<16x320xf32> to vector<1x16x320xf32>
    tpu.vector_store %arg6[%c0_31, %c0_32, %c0_33], %76 {strides = array<i32>} : memref<1x16x320xf32, #tpu.memory_space<vmem>>, vector<1x16x320xf32>,
    return
  }
  func.func @transform_0(%arg0: i32) -> (i32, i32, i32) {
    %c0_i32 = arith.constant 0 : i32
    %c0_i32_0 = arith.constant 0 : i32
    %c0_i32_1 = arith.constant 0 : i32
    return %arg0, %c0_i32, %c0_i32_0 : i32, i32, i32
  }
  func.func @transform_1(%arg0: i32) -> (i32, i32) {
    %c0_i32 = arith.constant 0 : i32
    %c0_i32_0 = arith.constant 0 : i32
    %c0_i32_1 = arith.constant 0 : i32
    return %c0_i32, %c0_i32_0 : i32, i32
  }
  func.func @transform_2(%arg0: i32) -> (i32, i32) {
    %c0_i32 = arith.constant 0 : i32
    %c0_i32_0 = arith.constant 0 : i32
    %c0_i32_1 = arith.constant 0 : i32
    return %c0_i32, %c0_i32_0 : i32, i32
  }
  func.func @transform_3(%arg0: i32) -> (i32, i32) {
    %c0_i32 = arith.constant 0 : i32
    %c0_i32_0 = arith.constant 0 : i32
    %c0_i32_1 = arith.constant 0 : i32
    return %c0_i32, %c0_i32_0 : i32, i32
  }
  func.func @transform_4(%arg0: i32) -> (i32, i32) {
    %c0_i32 = arith.constant 0 : i32
    %c0_i32_0 = arith.constant 0 : i32
    %c0_i32_1 = arith.constant 0 : i32
    return %c0_i32, %c0_i32_0 : i32, i32
  }
  func.func @transform_5(%arg0: i32) -> (i32, i32, i32) {
    %c0_i32 = arith.constant 0 : i32
    %c0_i32_0 = arith.constant 0 : i32
    %c0_i32_1 = arith.constant 0 : i32
    return %arg0, %c0_i32, %c0_i32_0 : i32, i32, i32
  }
}

</mosaic_0001>

<bundles_post_ra>
// kernel: growing_ca_forward.1
= control target key start
LH: loop header
LB: loop body
LE: loop exit
PB: predicated region body
PF: predicated region fallthrough
CT: control target
= control target key end

     0   :  { %s1828_s18 = smov 0   ;;  %s2437_s0 = inlined_call_operand.vmem [shape: f32[2,16,420], index: 0, kind: input, shape index: {}]   ;;  %s2438_s1 = inlined_call_operand.vmem [shape: f32[1,362], index: 1, kind: input, shape index: {}]   ;;  %s2439_s2 = inlined_call_operand.vmem [shape: f32[128,48], index: 2, kind: input, shape index: {}]   ;;  %s2440_s3 = inlined_call_operand.vmem [shape: f32[128,1], index: 3, kind: input, shape index: {}]   ;;  %s2441_s4 = inlined_call_operand.vmem [shape: f32[16,128], index: 4, kind: input, shape index: {}]   ;;  %s2442_s5 = inlined_call_operand.vmem [shape: f32[2,16,320], index: 5, kind: output, shape index: {}]  }
   0x1 LB: > { %s1572_s19 = sadd.s32 4294967295, %s1782_s18   ;;  %p1576_p0 = scmp.ge.s32.totalorder %s1782_s18, 1  ;;  %s1782_s18 = sphi %s1828_s18, %s15_s18  }
   0x2   : > { %p187_p1 = scmp.lt.s32.totalorder %s1782_s18, 3 }
   0x4   : > { %p188_p2 = pnand %p1576_p0, %p187_p1 }
   0x5   : > { %p215_p3 = scmp.lt.s32.totalorder (!%p188_p2), %s1572_s19, 1  ;;  %s1784_s24 = smov (!%p188_p2), 127  }
   0x6   : > { %191 = sbr.rel (%p188_p2) target bundleno = 1680 (0x690), region = 40  ;;  %s1785_s25 = smov (!%p188_p2), 126  }
   0x7   : > { %s1786_s26 = smov (!%p188_p2), 108   ;;  %s1787_s27 = smov (!%p188_p2), 88  }
   0x8   : > { %s1788_s28 = smov (!%p188_p2), 40   ;;  %s1789_s29 = smov (!%p188_p2), 2  }
   0x9   : > { %s1790_s30 = smov (!%p188_p2), 109   ;;  %s1791_s6 = smov (!%p188_p2), 19  }
   0xa   : > { %s1792_s7 = smov (!%p188_p2), 107  }
   0xb   : > { %s2444_s19 = smov (!%p215_p3, %s1572_s19), 1  ;;  %vm372_vm0 = vcmask 1039360   ;;  %vm411_vm1 = vcmask 1031168   ;;  %vm255_vm2 = vcmask 883712   ;;  %vm298_vm3 = vcmask 719872  }
   0xc   : > { %s1616_s20 = sshll.u32 %s2444_s19, 6  ;;  %vm452_vm4 = vcmask 326656   ;;  %vm335_vm5 = vcmask 15360   ;;  %vm520_vm6 = vcmask 891904   ;;  %vm491_vm7 = vcmask 154624  }
   0xd   : > { %s1842_s23 = scalar_lea.vmem %s2437_s0, %s1616_s20  ;;  %vm675_vm8 = vcmask 875520   ;;  %vm706_vm9 = vcmask 392192   ;;  %vm1281_vm10 = vcmask 171008  }
   0xe   : > { %v1845_v0 = vld [vmem:[%s1842_s23 + $0x30] sm:$0xff]  ;;  %v1848_v1 = vld [vmem:[%s1842_s23 + $0x20] sm:$0xff]  ;;  %v1851_v2 = vld [vmem:[%s1842_s23 + $0x38] sm:$0xff] }
   0xf   : > { %v236_v3 = vmul.f32 2.0, %v1845_v0  ;;  %v234_v4 = vmul.f32 2.0, %v1848_v1  ;;  %v1856_v5 = vld [vmem:[%s1842_s23 + $0x28] sm:$0xff]  ;;  %v353_v6 = vmul.f32 2.0, %v1851_v2  ;;  %v1866_v9 = vld [vmem:[%s1842_s23] sm:$0xff]  ;;  %v1873_v12 = vld [vmem:[%s1842_s23 + $0x18] sm:$0xff] }
  0x10   : > { %v235_v7 = vmul.f32 2.0, %v1856_v5  ;;  %v1863_v8 = vld [vmem:[%s1842_s23 + $0x8] sm:$0xff]  ;;  %v231_v11 = vmul.f32 2.0, %v1866_v9  ;;  %v1876_v13 = vld [vmem:[%s1842_s23 + $0x10] sm:$0xff]  ;;  %v352_v14 = vmul.f32 2.0, %v1873_v12 }
  0x11   : > { %368 = vrot.lane.b32.xlu1 %v236_v3, %s1784_s24  ;;  %364 = vrot.lane.b32.xlu0 %v234_v4, %s1784_s24  ;;  %v232_v10 = vmul.f32 2.0, %v1863_v8  ;;  %v233_v15 = vmul.f32 2.0, %v1876_v13 }
  0x15   : > { %370 = vrot.lane.b32.xlu1 %v353_v6, %s1784_s24  ;;  %366 = vrot.lane.b32.xlu0 %v235_v7, %s1784_s24 }
  0x19   : > { %358 = vrot.lane.b32.xlu1 %v232_v10, %s1784_s24  ;;  %356 = vrot.lane.b32.xlu0 %v231_v11, %s1784_s24 }
  0x1d   : > { %362 = vrot.lane.b32.xlu1 %v352_v14, %s1784_s24  ;;  %360 = vrot.lane.b32.xlu0 %v233_v15, %s1784_s24 }
  0x21   : > { %405 = vrot.lane.b32.xlu1 %v1856_v5, %s1785_s25  ;;  %403 = vrot.lane.b32.xlu0 %v1848_v1, %s1785_s25 }
  0x25   : > { %409 = vrot.lane.b32.xlu1 %v1851_v2, %s1785_s25  ;;  %407 = vrot.lane.b32.xlu0 %v1845_v0, %s1785_s25 }
  0x29   : > { %251 = vrot.lane.b32.xlu1 %v235_v7, %s1786_s26  ;;  %249 = vrot.lane.b32.xlu0 %v234_v4, %s1786_s26 }
  0x2d   : > { %395 = vrot.lane.b32.xlu1 %v1866_v9, %s1785_s25  ;;  %253 = vrot.lane.b32.xlu0 %v236_v3, %s1786_s26 }
  0x31   : > { %399 = vrot.lane.b32.xlu1 %v1876_v13, %s1785_s25  ;;  %397 = vrot.lane.b32.xlu0 %v1863_v8, %s1785_s25 }
  0x35   : > { %243 = vrot.lane.b32.xlu1 %v231_v11, %s1786_s26  ;;  %401 = vrot.lane.b32.xlu0 %v1873_v12, %s1785_s25 }
  0x39   : > { %247 = vrot.lane.b32.xlu1 %v233_v15, %s1786_s26  ;;  %245 = vrot.lane.b32.xlu0 %v232_v10, %s1786_s26 }
  0x3d   : > { %292 = vrot.lane.b32.xlu1 %v1856_v5, %s1787_s27  ;;  %290 = vrot.lane.b32.xlu0 %v1848_v1, %s1787_s27 }
  0x41   : > { %296 = vrot.lane.b32.xlu1 %v1851_v2, %s1787_s27  ;;  %294 = vrot.lane.b32.xlu0 %v1845_v0, %s1787_s27 }
  0x45   : > { %284 = vrot.lane.b32.xlu1 %v1863_v8, %s1787_s27  ;;  %282 = vrot.lane.b32.xlu0 %v1866_v9, %s1787_s27 }
  0x49   : > { %288 = vrot.lane.b32.xlu1 %v1873_v12, %s1787_s27  ;;  %286 = vrot.lane.b32.xlu0 %v1876_v13, %s1787_s27 }
  0x83   : > { %v1922_v16 = vpop.permute.xlu1 %368  ;;  %v365_v17 = vpop.permute.xlu0 %364 }
  0x87   : > { %v1924_v18 = vpop.permute.xlu1 %370  ;;  %v367_v19 = vpop.permute.xlu0 %366 }
  0x88   : > { %v377_v26 = vsel %vm372_vm0, %v367_v19, %v1922_v16  ;;  %v376_v57 = vsel %vm372_vm0, %v365_v17, %v367_v19  ;;  %v378_v10 = vsel %vm372_vm0, %v1922_v16, %v1924_v18 }
  0x89   : > { %v392_v27 = vadd.f32 %v377_v26, %v1856_v5  ;;  %v391_v3 = vadd.f32 %v376_v57, %v1848_v1  ;;  %v393_v19 = vadd.f32 %v378_v10, %v1845_v0 }
  0x8b   : > { %v1926_v20 = vpop.permute.xlu1 %358  ;;  %v357_v21 = vpop.permute.xlu0 %356 }
  0x8c   : > { %v373_v36 = vsel %vm372_vm0, %v357_v21, %v1926_v20 }
  0x8d   : > { %v387_v37 = vadd.f32 %v373_v36, %v1866_v9 }
  0x8f   : > { %v1928_v22 = vpop.permute.xlu1 %362  ;;  %v1930_v23 = vpop.permute.xlu0 %360 }
  0x90   : > { %v375_v40 = vsel %vm372_vm0, %v1930_v23, %v1928_v22  ;;  %v374_v16 = vsel %vm372_vm0, %v1926_v20, %v1930_v23 }
  0x91   : > { %v389_v43 = vadd.f32 %v375_v40, %v1876_v13 }
  0x93   : > { %v406_v24 = vpop.permute.xlu1 %405  ;;  %v404_v25 = vpop.permute.xlu0 %403 }
  0x94   : > { %v415_v63 = vsel %vm411_vm1, %v404_v25, %v406_v24 }
  0x95   : > { %v430_v14 = vadd.f32 %v415_v63, %v391_v3 }
  0x97   : > { %v1935_v28 = vpop.permute.xlu1 %409  ;;  %v408_v29 = vpop.permute.xlu0 %407 }
  0x98   : > { %v416_v30 = vsel %vm411_vm1, %v406_v24, %v408_v29  ;;  %v417_v17 = vsel %vm411_vm1, %v408_v29, %v1935_v28 }
  0x99   : > { %v1938_v31 = vadd.f32 %v416_v30, %v392_v27  ;;  %v432_v30 = vadd.f32 %v417_v17, %v393_v19 }
  0x9b   : > { %v1940_v32 = vpop.permute.xlu1 %251  ;;  %448 = vrot.lane.b32.xlu1 %v1938_v31, %s1788_s28  ;;  %v250_v33 = vpop.permute.xlu0 %249 }
  0x9f   : > { %v396_v34 = vpop.permute.xlu1 %395  ;;  %v254_v35 = vpop.permute.xlu0 %253 }
  0xa0   : > { %v259_v52 = vsel %vm255_vm2, %v1940_v32, %v254_v35  ;;  %v271_v54 = vadd.f32 %v254_v35, %v1845_v0  ;;  %v258_v35 = vsel %vm255_vm2, %v250_v33, %v1940_v32 }
  0xa1   : > { %v270_v53 = vadd.f32 %v259_v52, %v1856_v5  ;;  %v269_v23 = vadd.f32 %v258_v35, %v1848_v1 }
  0xa3   : > { %v400_v38 = vpop.permute.xlu1 %399  ;;  %v398_v39 = vpop.permute.xlu0 %397 }
  0xa4   : > { %v412_v41 = vsel %vm411_vm1, %v396_v34, %v398_v39  ;;  %v413_v29 = vsel %vm411_vm1, %v398_v39, %v400_v38  ;;  %v388_v34 = vadd.f32 %v374_v16, %v1863_v8 }
  0xa5   : > { %v1951_v42 = vadd.f32 %v412_v41, %v387_v37 }
  0xa6   : > { %v427_v36 = vadd.f32 %v413_v29, %v388_v34 }
  0xa7   : > { %v244_v44 = vpop.permute.xlu1 %243  ;;  %440 = vrot.lane.b32.xlu1 %v1951_v42, %s1788_s28  ;;  %v1956_v45 = vpop.permute.xlu0 %401 }
  0xa8   : > { %v414_v46 = vsel %vm411_vm1, %v400_v38, %v1956_v45 }
  0xa9   : > { %v1960_v47 = vadd.f32 %v414_v46, %v389_v43 }
  0xab   : > { %v248_v48 = vpop.permute.xlu1 %247  ;;  %444 = vrot.lane.b32.xlu1 %v1960_v47, %s1788_s28  ;;  %v246_v49 = vpop.permute.xlu0 %245 }
  0xac   : > { %v256_v58 = vsel %vm255_vm2, %v244_v44, %v246_v49  ;;  %v268_v21 = vadd.f32 %v248_v48, %v1876_v13  ;;  %v257_v37 = vsel %vm255_vm2, %v246_v49, %v248_v48 }
  0xad   : > { %v266_v4 = vadd.f32 %v256_v58, %v1866_v9  ;;  %v267_v40 = vadd.f32 %v257_v37, %v1863_v8 }
  0xaf   : > { %v293_v50 = vpop.permute.xlu1 %292  ;;  %v291_v51 = vpop.permute.xlu0 %290 }
  0xb0   : > { %v302_v20 = vsel %vm298_vm3, %v291_v51, %v293_v50  ;;  %v394_v51 = vadd.f32 %v1924_v18, %v1851_v2 }
  0xb1   : > { %v314_v38 = vadd.f32 %v302_v20, %v269_v23 }
  0xb2   : > { %v433_v49 = vadd.f32 %v1935_v28, %v394_v51  ;;  %v551_v51 = vld [vmem:[%s2440_s3 + $0x40] sm:$0xff] }
  0xb3   : > { %v297_v55 = vpop.permute.xlu1 %296  ;;  %v295_v56 = vpop.permute.xlu0 %294 }
  0xb4   : > { %v303_v59 = vsel %vm298_vm3, %v293_v50, %v295_v56  ;;  %v304_v60 = vsel %vm298_vm3, %v295_v56, %v297_v55 }
  0xb5   : > { %v1972_v61 = vadd.f32 %v303_v59, %v270_v53  ;;  %v1974_v62 = vadd.f32 %v304_v60, %v271_v54  ;;  %v390_v53 = vadd.f32 %v1928_v22, %v1873_v12 }
  0xb7   : > { %v285_v6 = vpop.permute.xlu1 %284  ;;  %333 = vrot.lane.b32.xlu0 %v1974_v62, %s1789_s29  ;;  %331 = vrot.lane.b32.xlu1 %v1972_v61, %s1789_s29  ;;  %v283_v7 = vpop.permute.xlu0 %282  ;;  %v429_v57 = vadd.f32 %v1956_v45, %v390_v53  ;;  %v547_v53 = vld [vmem:[%s2440_s3 + $0x20] sm:$0xff] }
  0xb8   : > { %v299_v11 = vsel %vm298_vm3, %v283_v7, %v285_v6 }
  0xb9   : > { %v311_v15 = vadd.f32 %v299_v11, %v266_v4 }
  0xbb   : > { %v289_v24 = vpop.permute.xlu1 %288  ;;  %446 = vrot.lane.b32.xlu0 %v430_v14, %s1788_s28  ;;  %323 = vrot.lane.b32.xlu1 %v311_v15, %s1789_s29  ;;  %v287_v25 = vpop.permute.xlu0 %286 }
  0xbc   : > { %v301_v26 = vsel %vm298_vm3, %v287_v25, %v289_v24  ;;  %v300_v39 = vsel %vm298_vm3, %v285_v6, %v287_v25 }
  0xbd   : > { %v1997_v27 = vadd.f32 %v301_v26, %v268_v21  ;;  %v312_v41 = vadd.f32 %v300_v39, %v267_v40  ;;  %v1793_v40 = vmov 0.0  }
  0xbe   : > { %819 = vmatprep.mubr.f32.mxu0 %v1793_v40  ;;  %897 = vmatprep.mubr.f32.mxu1 %v1793_v40 }
  0xbf   : > { %450 = vrot.lane.b32.xlu0 %v432_v30, %s1788_s28  ;;  %327 = vrot.lane.b32.xlu1 %v1997_v27, %s1789_s29 }
  0xc3   : > { %442 = vrot.lane.b32.xlu0 %v427_v36, %s1788_s28 }
  0xc7   : > { %329 = vrot.lane.b32.xlu0 %v314_v38, %s1789_s29 }
  0xcb   : > { %325 = vrot.lane.b32.xlu0 %v312_v41, %s1789_s29 }
 0x10d   : > { %v449_v32 = vpop.permute.xlu1 %448 }
 0x119   : > { %v441_v33 = vpop.permute.xlu1 %440 }
 0x11a   : > { %v465_v54 = vsub.f32 %v1951_v42, %v441_v33 }
 0x11d   : > { %v445_v43 = vpop.permute.xlu1 %444 }
 0x11e   : > { %v468_v18 = vsub.f32 %v429_v57, %v445_v43  ;;  %v543_v57 = vld [vmem:[%s2440_s3] sm:$0xff] }
 0x129   : > { %v334_v44 = vpop.permute.xlu0 %333  ;;  %v332_v46 = vpop.permute.xlu1 %331 }
 0x12d   : > { %v447_v50 = vpop.permute.xlu0 %446  ;;  %v324_v56 = vpop.permute.xlu1 %323 }
 0x12e   : > { %v469_v48 = vsub.f32 %v430_v14, %v447_v50  ;;  %v346_v28 = vsub.f32 %v311_v15, %v324_v56  ;;  %v455_v59 = vsel %vm452_vm4, %v447_v50, %v449_v32  ;;  %v339_v14 = vsel %vm335_vm5, %v332_v46, %v334_v44  ;;  %v558_v44 = vld [vmem:[%s2440_s3 + $0x78] sm:$0xff] }
 0x12f   : > { %v470_v45 = vsub.f32 %v1938_v31, %v455_v59  ;;  %v351_v31 = vsub.f32 %v1974_v62, %v339_v14  ;;  %v554_v50 = vld [vmem:[%s2440_s3 + $0x58] sm:$0xff] }
 0x130   : > { %512 = vrot.lane.b32.xlu1 %v469_v48, %s1790_s30  ;;  %v552_v48 = vld [vmem:[%s2440_s3 + $0x48] sm:$0xff] }
 0x131   : > { %v451_v52 = vpop.permute.xlu0 %450  ;;  %v328_v7 = vpop.permute.xlu1 %327 }
 0x132   : > { %v472_v55 = vsub.f32 %v433_v49, %v451_v52  ;;  %v456_v58 = vsel %vm452_vm4, %v449_v32, %v451_v52  ;;  %v549_v49 = vld [vmem:[%s2440_s3 + $0x30] sm:$0xff]  ;;  %v550_v52 = vld [vmem:[%s2440_s3 + $0x38] sm:$0xff] }
 0x133   : > { %v471_v22 = vsub.f32 %v432_v30, %v456_v58 }
 0x134   : > { %504 = vrot.lane.b32.xlu1 %v465_v54, %s1790_s30  ;;  %518 = vrot.lane.b32.xlu0 %v472_v55, %s1790_s30  ;;  %v548_v54 = vld [vmem:[%s2440_s3 + $0x28] sm:$0xff]  ;;  %v545_v55 = vld [vmem:[%s2440_s3 + $0x10] sm:$0xff] }
 0x135   : > { %v443_v2 = vpop.permute.xlu0 %442 }
 0x136   : > { %v454_v60 = vsel %vm452_vm4, %v443_v2, %v445_v43  ;;  %v453_v3 = vsel %vm452_vm4, %v441_v33, %v443_v2  ;;  %v1794_v43 = vmov 0   ;;  %v544_v2 = vld [vmem:[%s2440_s3 + $0x8] sm:$0xff] }
 0x137   : > { %v467_v63 = vsub.f32 %v1960_v47, %v454_v60  ;;  %v466_v10 = vsub.f32 %v427_v36, %v453_v3  ;;  %1764 = vset.pattern.permute.xlu1 %v1794_v43  ;;  %1763 = vset.pattern.permute.xlu0 %v1794_v43 }
 0x138   : > { %479 = vrot.lane.b32.xlu1 %v346_v28, %s1791_s6  ;;  %510 = vrot.lane.b32.xlu0 %v468_v18, %s1790_s30 }
 0x139   : > { %v330_v12 = vpop.permute.xlu0 %329 }
 0x13a   : > { %v349_v42 = vsub.f32 %v314_v38, %v330_v12  ;;  %v338_v4 = vsel %vm335_vm5, %v330_v12, %v332_v46  ;;  %v553_v46 = vld [vmem:[%s2440_s3 + $0x50] sm:$0xff] }
 0x13b   : > { %v350_v11 = vsub.f32 %v1972_v61, %v338_v4 }
 0x13c   : > { %516 = vrot.lane.b32.xlu1 %v471_v22, %s1790_s30  ;;  %485 = vrot.lane.b32.xlu0 %v349_v42, %s1791_s6 }
 0x13d   : > { %v326_v6 = vpop.permute.xlu0 %325 }
 0x13e   : > { %v337_v15 = vsel %vm335_vm5, %v326_v6, %v328_v7  ;;  %v336_v17 = vsel %vm335_vm5, %v324_v56, %v326_v6  ;;  %v546_v56 = vld [vmem:[%s2440_s3 + $0x18] sm:$0xff] }
 0x13f   : > { %v348_v47 = vsub.f32 %v1997_v27, %v337_v15  ;;  %v347_v19 = vsub.f32 %v312_v41, %v336_v17 }
 0x140   : > { %508 = vrot.lane.b32.xlu1 %v467_v63, %s1790_s30  ;;  %514 = vrot.lane.b32.xlu0 %v470_v45, %s1790_s30 }
 0x144   : > { %506 = vrot.lane.b32.xlu0 %v466_v10, %s1790_s30  ;;  %487 = vrot.lane.b32.xlu1 %v350_v11, %s1791_s6 }
 0x148   : > { %489 = vrot.lane.b32.xlu0 %v351_v31, %s1791_s6  ;;  %483 = vrot.lane.b32.xlu1 %v348_v47, %s1791_s6 }
 0x14c   : > { %481 = vrot.lane.b32.xlu0 %v347_v19, %s1791_s6  ;;  %649 = vrot.lane.b32.xlu1 %v1845_v0, %s1792_s7  ;;  %s1795_s6 = smov 21  }
 0x150   : > { %647 = vrot.lane.b32.xlu0 %v1856_v5, %s1792_s7 }
 0x154   : > { %645 = vrot.lane.b32.xlu0 %v1848_v1, %s1792_s7 }
 0x1a2   : > { %v513_v61 = vpop.permute.xlu1 %512 }
 0x1a6   : > { %v505_v62 = vpop.permute.xlu1 %504  ;;  %v519_v21 = vpop.permute.xlu0 %518 }
 0x1aa   : > { %v480_v24 = vpop.permute.xlu1 %479  ;;  %v511_v25 = vpop.permute.xlu0 %510 }
 0x1ab   : > { %651 = vrot.lane.b32.xlu1 %v480_v24, %s1792_s7 }
 0x1ae   : > { %v517_v16 = vpop.permute.xlu1 %516  ;;  %v486_v26 = vpop.permute.xlu0 %485 }
 0x1af   : > { %657 = vrot.lane.b32.xlu0 %v486_v26, %s1792_s7  ;;  %v526_v0 = vsel %vm520_vm6, %v517_v16, %v519_v21 }
 0x1b0   : > { %673 = vrot.lane.b32.xlu1 %v526_v0, %s1792_s7  ;;  %v527_v0 = vld [vmem:[%s2439_s2] sm:$0xff] }
 0x1b2   : > { %v515_v5 = vpop.permute.xlu0 %514  ;;  %v509_v1 = vpop.permute.xlu1 %508 }
 0x1b3   : > { %v525_v27 = vsel %vm520_vm6, %v515_v5, %v517_v16  ;;  %v524_v29 = vsel %vm520_vm6, %v513_v61, %v515_v5  ;;  %v523_v36 = vsel %vm520_vm6, %v509_v1, %v511_v25  ;;  %v2146_v5 = vld [vmem:[%s2439_s2 + $0x68] sm:$0xff] }
 0x1b4   : > { %671 = vrot.lane.b32.xlu0 %v525_v27, %s1792_s7 }
 0x1b6   : > { %v507_v30 = vpop.permute.xlu0 %506  ;;  %v488_v23 = vpop.permute.xlu1 %487 }
 0x1b7   : > { %v522_v34 = vsel %vm520_vm6, %v507_v30, %v509_v1  ;;  %v521_v20 = vsel %vm520_vm6, %v505_v62, %v507_v30  ;;  %v494_v37 = vsel %vm491_vm7, %v486_v26, %v488_v23  ;;  %v528_v1 = vld [vmem:[%s2439_s2 + $0x8] sm:$0xff]  ;;  %v541_v30 = vld [vmem:[%s2439_s2 + $0x70] sm:$0xff] }
 0x1b8   : > { %669 = vrot.lane.b32.xlu0 %v524_v29, %s1792_s7  ;;  %665 = vrot.lane.b32.xlu1 %v522_v34, %s1792_s7  ;;  %v529_v29 = vld [vmem:[%s2439_s2 + $0x10] sm:$0xff]  ;;  %v542_v34 = vld [vmem:[%s2439_s2 + $0x78] sm:$0xff] }
 0x1ba   : > { %v490_v35 = vpop.permute.xlu0 %489  ;;  %v484_v41 = vpop.permute.xlu1 %483 }
 0x1bb   : > { %v495_v38 = vsel %vm491_vm7, %v488_v23, %v490_v35  ;;  %v530_v35 = vld [vmem:[%s2439_s2 + $0x18] sm:$0xff]  ;;  %v533_v23 = vld [vmem:[%s2439_s2 + $0x30] sm:$0xff] }
 0x1bc   : > { %667 = vrot.lane.b32.xlu0 %v523_v36, %s1792_s7  ;;  %663 = vrot.lane.b32.xlu1 %v521_v20, %s1792_s7  ;;  %v531_v36 = vld [vmem:[%s2439_s2 + $0x20] sm:$0xff]  ;;  %v532_v20 = vld [vmem:[%s2439_s2 + $0x28] sm:$0xff] }
 0x1be   : > { %v482_v39 = vpop.permute.xlu0 %481  ;;  %v2126_v28 = vpop.permute.xlu1 %649 }
 0x1bf   : > { %v493_v32 = vsel %vm491_vm7, %v482_v39, %v484_v41  ;;  %v492_v33 = vsel %vm491_vm7, %v480_v24, %v482_v39  ;;  %v536_v39 = vld [vmem:[%s2439_s2 + $0x48] sm:$0xff]  ;;  %v537_v41 = vld [vmem:[%s2439_s2 + $0x50] sm:$0xff] }
 0x1c0   : > { %659 = vrot.lane.b32.xlu0 %v494_v37, %s1792_s7  ;;  %661 = vrot.lane.b32.xlu1 %v495_v38, %s1792_s7  ;;  %v534_v37 = vld [vmem:[%s2439_s2 + $0x38] sm:$0xff]  ;;  %v535_v38 = vld [vmem:[%s2439_s2 + $0x40] sm:$0xff] }
 0x1c2   : > { %v648_v18 = vpop.permute.xlu0 %647 }
 0x1c3   : > { %v679_v62 = vsel %vm675_vm8, %v648_v18, %v2126_v28 }
 0x1c4   : > { %655 = vrot.lane.b32.xlu0 %v493_v32, %s1792_s7  ;;  %653 = vrot.lane.b32.xlu1 %v492_v33, %s1792_s7  ;;  %v538_v32 = vld [vmem:[%s2439_s2 + $0x58] sm:$0xff]  ;;  %v539_v33 = vld [vmem:[%s2439_s2 + $0x60] sm:$0xff] }
 0x1c6   : > { %v646_v58 = vpop.permute.xlu0 %645 }
 0x1c7   : > { %v678_v25 = vsel %vm675_vm8, %v646_v58, %v648_v18 }
 0x1c8   : > { %643 = vrot.lane.b32.xlu0 %v1876_v13, %s1792_s7  ;;  %641 = vrot.lane.b32.xlu1 %v1863_v8, %s1792_s7  ;;  %v557_v13 = vld [vmem:[%s2440_s3 + $0x70] sm:$0xff]  ;;  %v555_v8 = vld [vmem:[%s2440_s3 + $0x60] sm:$0xff] }
 0x1cc   : > { %639 = vrot.lane.b32.xlu1 %v1866_v9, %s1792_s7  ;;  %636 = vperm.xlu0 %1763, %v558_v44   ;;  %v556_v9 = vld [vmem:[%s2440_s3 + $0x68] sm:$0xff]  ;;  %v2245_v44 = vld [vmem:[%s2441_s4] sm:$0xff] }
 0x1d0   : > { %631 = vperm.xlu1 %1764, %v557_v13   ;;  %621 = vperm.xlu0 %1763, %v555_v8  }
 0x1d4   : > { %626 = vperm.xlu1 %1764, %v556_v9   ;;  %611 = vperm.xlu0 %1763, %v553_v46  }
 0x1d8   : > { %616 = vperm.xlu1 %1764, %v554_v50   ;;  %601 = vperm.xlu0 %1763, %v551_v51  }
 0x1dc   : > { %606 = vperm.xlu1 %1764, %v552_v48   ;;  %591 = vperm.xlu0 %1763, %v549_v49  }
 0x1e0   : > { %596 = vperm.xlu1 %1764, %v550_v52   ;;  %581 = vperm.xlu0 %1763, %v547_v53  }
 0x1e4   : > { %586 = vperm.xlu1 %1764, %v548_v54   ;;  %571 = vperm.xlu0 %1763, %v545_v55  }
 0x1e8   : > { %576 = vperm.xlu1 %1764, %v546_v56   ;;  %561 = vperm.xlu0 %1763, %v543_v57  }
 0x1ec   : > { %566 = vperm.xlu1 %1764, %v544_v2  }
 0x21d   : > { %v652_v12 = vpop.permute.xlu1 %651 }
 0x221   : > { %v658_v22 = vpop.permute.xlu0 %657 }
 0x222   : > { %v674_v42 = vpop.permute.xlu1 %673 }
 0x226   : > { %v672_v59 = vpop.permute.xlu0 %671 }
 0x227   : > { %v687_v60 = vsel %vm675_vm8, %v672_v59, %v674_v42 }
 0x228   : > { %775 = vmatprep.subr.mxu0 %v687_v60  ;;  %1728 = vmatprep.subr.mxu1 %v687_v60 }
 0x22a   : > { %v666_v45 = vpop.permute.xlu1 %665  ;;  %v670_v63 = vpop.permute.xlu0 %669 }
 0x22b   : > { %v686_v3 = vsel %vm675_vm8, %v670_v63, %v672_v59 }
 0x22c   : > { %776 = vmatpush1.msra.mxu0 %v686_v3  ;;  %1734 = vmatpush1.msra.mxu1 %v686_v3 }
 0x22e   : > { %v664_v4 = vpop.permute.xlu1 %663  ;;  %v668_v6 = vpop.permute.xlu0 %667 }
 0x22f   : > { %v685_v7 = vsel %vm675_vm8, %v666_v45, %v668_v6  ;;  %v684_v10 = vsel %vm675_vm8, %v664_v4, %v666_v45 }
 0x230   : > { %777 = vmatprep.subr.mxu0 %v685_v7  ;;  %1729 = vmatprep.subr.mxu1 %v685_v7 }
 0x231   : > { %778 = vmatpush1.msra.mxu0 %v684_v10  ;;  %1735 = vmatpush1.msra.mxu1 %v684_v10 }
 0x232   : > { %v662_v11 = vpop.permute.xlu1 %661  ;;  %v660_v14 = vpop.permute.xlu0 %659 }
 0x233   : > { %v683_v15 = vsel %vm675_vm8, %v660_v14, %v662_v11  ;;  %v682_v31 = vsel %vm675_vm8, %v658_v22, %v660_v14 }
 0x234   : > { %779 = vmatprep.subr.mxu0 %v683_v15  ;;  %1730 = vmatprep.subr.mxu1 %v683_v15 }
 0x235   : > { %780 = vmatpush1.msra.mxu0 %v682_v31  ;;  %1736 = vmatpush1.msra.mxu1 %v682_v31 }
 0x236   : > { %v654_v47 = vpop.permute.xlu1 %653  ;;  %v656_v17 = vpop.permute.xlu0 %655 }
 0x237   : > { %v681_v19 = vsel %vm675_vm8, %v654_v47, %v656_v17  ;;  %v680_v61 = vsel %vm675_vm8, %v652_v12, %v654_v47 }
 0x238   : > { %781 = vmatprep.subr.mxu0 %v681_v19  ;;  %1731 = vmatprep.subr.mxu1 %v681_v19 }
 0x239   : > { %782 = vmatpush1.msra.mxu0 %v680_v61  ;;  %1737 = vmatpush1.msra.mxu1 %v680_v61 }
 0x23a   : > { %v642_v21 = vpop.permute.xlu1 %641  ;;  %783 = vmatprep.subr.mxu0 %v679_v62  ;;  %1732 = vmatprep.subr.mxu1 %v679_v62  ;;  %v644_v24 = vpop.permute.xlu0 %643 }
 0x23b   : > { %784 = vmatpush1.msra.mxu0 %v678_v25  ;;  %1738 = vmatpush1.msra.mxu1 %v678_v25  ;;  %v677_v16 = vsel %vm675_vm8, %v642_v21, %v644_v24 }
 0x23c   : > { %785 = vmatprep.subr.mxu0 %v677_v16  ;;  %1733 = vmatprep.subr.mxu1 %v677_v16 }
 0x23e   : > { %v640_v26 = vpop.permute.xlu1 %639 }
 0x23f   : > { %v676_v27 = vsel %vm675_vm8, %v640_v26, %v642_v21 }
 0x240   : > { %786 = vmatpush1.msra.mxu0 %v676_v27  ;;  %1739 = vmatpush1.msra.mxu1 %v676_v27 }
 0x241   : > { %1580 = vmatmul.mubr.msk.f32.vlgmr.msra.gmra.mxu0 %vm706_vm9, %v527_v0  ;;  %1593 = vmatmul.mubr.msk.f32.vlgmr.msra.gmra.mxu1 %vm706_vm9, %v2146_v5 }
 0x242   : > { %1657 = vmatprep.subr.mxu1 %v674_v42  ;;  %825 = vmatprep.mubr.f32.mxu0 %v1793_v40 }
 0x243   : > { %1658 = vmatpush3.msra.mxu1 %v674_v42  ;;  %903 = vmatprep.mubr.f32.mxu1 %v1793_v40 }
 0x244   : > { %1659 = vmatprep.subr.mxu1 %v668_v6 }
 0x245   : > { %1660 = vmatpush3.msra.mxu1 %v668_v6  ;;  %1581 = vmatmul.mubr.msk.f32.gmra.mxu0 %vm706_vm9, %v528_v1 }
 0x246   : > { %1594 = vmatmul.mubr.msk.f32.gmra.mxu1 %vm706_vm9, %v541_v30  ;;  %1661 = vmatprep.subr.mxu1 %v662_v11 }
 0x247   : > { %1662 = vmatpush3.msra.mxu1 %v662_v11  ;;  %831 = vmatprep.mubr.f32.mxu0 %v1793_v40  ;;  %v637_v55 = vpop.permute.xlu0 %636 }
 0x248   : > { %1663 = vmatprep.subr.mxu1 %v656_v17  ;;  %909 = vmatprep.mubr.f32.mxu1 %v1793_v40 }
 0x249   : > { %1664 = vmatpush3.msra.mxu1 %v656_v17  ;;  %1582 = vmatmul.mubr.msk.f32.gmra.mxu0 %vm706_vm9, %v529_v29 }
 0x24a   : > { %1595 = vmatmul.mubr.msk.f32.gmra.mxu1 %vm706_vm9, %v542_v34  ;;  %1665 = vmatprep.subr.mxu1 %v2126_v28 }
 0x24b   : > { %1666 = vmatpush3.msra.mxu1 %v2126_v28  ;;  %837 = vmatprep.mubr.f32.mxu0 %v1793_v40  ;;  %v2256_v49 = vpop.permute.xlu1 %631 }
 0x24c   : > { %1667 = vmatprep.subr.mxu1 %v644_v24  ;;  %1669 = vmatprep.mubr.msk.f32.mxu1 %vm706_vm9, %v527_v0 }
 0x24d   : > { %1668 = vmatpush3.msra.mxu1 %v644_v24  ;;  %1583 = vmatmul.mubr.msk.f32.gmra.mxu0 %vm706_vm9, %v530_v35 }
 0x24e   : > { %1670 = vmatmul.mubr.msk.f32.vlgmr.msra.gmra.mxu1 %vm706_vm9, %v528_v1  ;;  %843 = vmatprep.mubr.f32.mxu0 %v1793_v40 }
 0x24f   : > { %1672 = vmatprep.mubr.msk.f32.mxu1 %vm706_vm9, %v529_v29  ;;  %v627_v12 = vpop.permute.xlu1 %626 }
 0x251   : > { %1584 = vmatmul.mubr.msk.f32.gmra.mxu0 %vm706_vm9, %v531_v36 }
 0x252   : > { %1673 = vmatmul.mubr.msk.f32.gmra.mxu1 %vm706_vm9, %v530_v35  ;;  %849 = vmatprep.mubr.f32.mxu0 %v1793_v40 }
 0x253   : > { %1675 = vmatprep.mubr.msk.f32.mxu1 %vm706_vm9, %v531_v36 }
 0x255   : > { %1585 = vmatmul.mubr.msk.f32.gmra.mxu0 %vm706_vm9, %v532_v20 }
 0x256   : > { %1676 = vmatmul.mubr.msk.f32.gmra.mxu1 %vm706_vm9, %v532_v20  ;;  %855 = vmatprep.mubr.f32.mxu0 %v1793_v40  ;;  %v617_v20 = vpop.permute.xlu1 %616 }
 0x257   : > { %1678 = vmatprep.mubr.msk.f32.mxu1 %vm706_vm9, %v533_v23 }
 0x259   : > { %1586 = vmatmul.mubr.msk.f32.gmra.mxu0 %vm706_vm9, %v533_v23 }
 0x25a   : > { %1679 = vmatmul.mubr.msk.f32.gmra.mxu1 %vm706_vm9, %v534_v37  ;;  %861 = vmatprep.mubr.f32.mxu0 %v1793_v40 }
 0x25b   : > { %1681 = vmatprep.mubr.msk.f32.mxu1 %vm706_vm9, %v535_v38 }
 0x25d   : > { %1587 = vmatmul.mubr.msk.f32.gmra.mxu0 %vm706_vm9, %v534_v37 }
 0x25e   : > { %1682 = vmatmul.mubr.msk.f32.gmra.mxu1 %vm706_vm9, %v536_v39  ;;  %867 = vmatprep.mubr.f32.mxu0 %v1793_v40 }
 0x25f   : > { %1684 = vmatprep.mubr.msk.f32.mxu1 %vm706_vm9, %v537_v41 }
 0x261   : > { %1588 = vmatmul.mubr.msk.f32.gmra.mxu0 %vm706_vm9, %v535_v38 }
 0x262   : > { %1685 = vmatmul.mubr.msk.f32.gmra.mxu1 %vm706_vm9, %v538_v32  ;;  %873 = vmatprep.mubr.f32.mxu0 %v1793_v40 }
 0x263   : > { %1687 = vmatprep.mubr.msk.f32.mxu1 %vm706_vm9, %v539_v33 }
 0x265   : > { %1589 = vmatmul.mubr.msk.f32.gmra.mxu0 %vm706_vm9, %v536_v39 }
 0x266   : > { %1688 = vmatmul.mubr.msk.f32.gmra.mxu1 %vm706_vm9, %v2146_v5  ;;  %879 = vmatprep.mubr.f32.mxu0 %v1793_v40 }
 0x267   : > { %1690 = vmatprep.mubr.msk.f32.mxu1 %vm706_vm9, %v541_v30  ;;  %v622_v30 = vpop.permute.xlu0 %621 }
 0x269   : > { %1590 = vmatmul.mubr.msk.f32.gmra.mxu0 %vm706_vm9, %v537_v41 }
 0x26a   : > { %1691 = vmatmul.mubr.msk.f32.gmra.mxu1 %vm706_vm9, %v542_v34  ;;  %885 = vmatprep.mubr.f32.mxu0 %v1793_v40 }
 0x26b   : > { %1175 = vmatprep.mubr.f32.mxu1 %v1793_v40  ;;  %v612_v38 = vpop.permute.xlu0 %611 }
 0x26d   : > { %1591 = vmatmul.mubr.msk.f32.gmra.mxu0 %vm706_vm9, %v538_v32 }
 0x26e   : > { %891 = vmatprep.mubr.f32.mxu0 %v1793_v40 }
 0x271   : > { %1592 = vmatmul.mubr.msk.f32.gmra.mxu0 %vm706_vm9, %v539_v33 }
 0x272   : > { %1725 = vmatprep.mubr.f32.mxu0 %v2245_v44 }
 0x301   : > { %v2248_v13 = vpop.f32.mrf.mxu0  ;;  %v899_v8 = vpop.f32.mrf.mxu1 }
 0x302   : > { %v900_v63 = vadd.f32 %v899_v8, %v627_v12 }
 0x303   : > { %v2250_v9 = vpop.f32.mrf.mxu0  ;;  %v901_v46 = vpop.f32.mrf.mxu1 }
 0x304   : > { %v902_v59 = vadd.f32 %v901_v46, %v627_v12  ;;  %v1100_v31 = vmax.f32 %v900_v63, 0.0  ;;  %v607_v46 = vpop.permute.xlu1 %606 }
 0x305   : > { %v2252_v50 = vpop.f32.mrf.mxu0 }
 0x306   : > { %v905_v51 = vpop.f32.mrf.mxu1  ;;  %v1101_v14 = vmax.f32 %v902_v59, 0.0 }
 0x307   : > { %v2254_v48 = vpop.f32.mrf.mxu0  ;;  %v906_v22 = vadd.f32 %v905_v51, %v2256_v49 }
 0x308   : > { %v907_v52 = vpop.f32.mrf.mxu1 }
 0x309   : > { %v2258_v53 = vpop.f32.mrf.mxu0  ;;  %v908_v18 = vadd.f32 %v907_v52, %v2256_v49  ;;  %v1103_v10 = vmax.f32 %v906_v22, 0.0 }
 0x30a   : > { %v911_v54 = vpop.f32.mrf.mxu1 }
 0x30b   : > { %v2260_v56 = vpop.f32.mrf.mxu0  ;;  %v912_v57 = vadd.f32 %v911_v54, %v637_v55  ;;  %v1104_v6 = vmax.f32 %v908_v18, 0.0  ;;  %v602_v18 = vpop.permute.xlu0 %601 }
 0x30c   : > { %v913_v2 = vpop.f32.mrf.mxu1 }
 0x30d   : > { %v914_v28 = vadd.f32 %v913_v2, %v637_v55  ;;  %v2263_v58 = vpop.f32.mrf.mxu0  ;;  %v1106_v3 = vmax.f32 %v912_v57, 0.0 }
 0x30e   : > { %v2266_v42 = vpop.f32.mrf.mxu1 }
 0x30f   : > { %v1107_v60 = vmax.f32 %v914_v28, 0.0  ;;  %v2268_v45 = vpop.f32.mrf.mxu0 }
 0x310   : > { %v2270_v4 = vpop.f32.mrf.mxu1 }
 0x311   : > { %1111 = vmatprep.subr.mxu1 %v1107_v60  ;;  %v2272_v7 = vpop.f32.mrf.mxu0 }
 0x312   : > { %v2274_v11 = vpop.f32.mrf.mxu1  ;;  %1112 = vmatpush1.msra.mxu1 %v1106_v3 }
 0x313   : > { %1113 = vmatprep.subr.mxu1 %v1104_v6  ;;  %v2276_v15 = vpop.f32.mrf.mxu0  ;;  %v597_v6 = vpop.permute.xlu1 %596 }
 0x314   : > { %v2278_v47 = vpop.f32.mrf.mxu1  ;;  %1114 = vmatpush1.msra.mxu1 %v1103_v10 }
 0x315   : > { %1115 = vmatprep.subr.mxu1 %v1101_v14  ;;  %v2280_v17 = vpop.f32.mrf.mxu0 }
 0x316   : > { %v2282_v19 = vpop.f32.mrf.mxu1  ;;  %1116 = vmatpush1.msra.mxu1 %v1100_v31  ;;  %v592_v31 = vpop.permute.xlu0 %591 }
 0x317   : > { %v2284_v61 = vpop.f32.mrf.mxu0 }
 0x318   : > { %v2286_v62 = vpop.f32.mrf.mxu1 }
 0x319   : > { %v2288_v21 = vpop.f32.mrf.mxu0 }
 0x31a   : > { %v2290_v24 = vpop.f32.mrf.mxu1 }
 0x31b   : > { %v2292_v25 = vpop.f32.mrf.mxu0 }
 0x31c   : > { %v2294_v16 = vpop.f32.mrf.mxu1 }
 0x31d   : > { %v2296_v26 = vpop.f32.mrf.mxu0 }
 0x31e   : > { %v1683_v0 = vpop.f32.mrf.mxu1 }
 0x31f   : > { %v2298_v5 = vpop.f32.mrf.mxu0 }
 0x320   : > { %v1022_v27 = vpop.f32.mrf.mxu1 }
 0x321   : > { %v2300_v1 = vpop.f32.mrf.mxu0 }
 0x322   : > { %v1686_v29 = vpop.f32.mrf.mxu1 }
 0x323   : > { %v2302_v34 = vpop.f32.mrf.mxu0  ;;  %v1038_v60 = vadd.f32 %v1686_v29, %v617_v20 }
 0x324   : > { %v1032_v35 = vpop.f32.mrf.mxu1 }
 0x325   : > { %v875_v36 = vpop.f32.mrf.mxu0 }
 0x326   : > { %v1689_v23 = vpop.f32.mrf.mxu1 }
 0x327   : > { %v877_v37 = vpop.f32.mrf.mxu0  ;;  %v1048_v52 = vadd.f32 %v1689_v23, %v627_v12 }
 0x328   : > { %v1042_v39 = vpop.f32.mrf.mxu1 }
 0x329   : > { %v881_v41 = vpop.f32.mrf.mxu0  ;;  %v1043_v28 = vadd.f32 %v1042_v39, %v622_v30  ;;  %v1102_v63 = vmax.f32 %v1048_v52, 0.0  ;;  %v1028_v39 = vadd.f32 %v1683_v0, %v607_v46  ;;  %v1023_v52 = vadd.f32 %v1022_v27, %v602_v18 }
 0x32a   : > { %v1692_v32 = vpop.f32.mrf.mxu1  ;;  %v876_v0 = vadd.f32 %v875_v36, %v607_v46 }
 0x32b   : > { %v1058_v33 = vadd.f32 %v1692_v32, %v637_v55  ;;  %v883_v8 = vpop.f32.mrf.mxu0  ;;  %v1033_v55 = vadd.f32 %v1032_v35, %v612_v38  ;;  %v1099_v10 = vmax.f32 %v1043_v28, 0.0  ;;  %v1096_v32 = vmax.f32 %v1038_v60, 0.0  ;;  %v587_v35 = vpop.permute.xlu1 %586 }
 0x32c   : > { %v1052_v51 = vpop.f32.mrf.mxu1  ;;  %v878_v28 = vadd.f32 %v877_v37, %v607_v46  ;;  %v870_v37 = vadd.f32 %v2300_v1, %v602_v18  ;;  %v1008_v46 = vadd.f32 %v2282_v19, %v587_v35 }
 0x32d   : > { %v1108_v54 = vmax.f32 %v1058_v33, 0.0  ;;  %v1053_v57 = vadd.f32 %v1052_v51, %v2256_v49  ;;  %v887_v2 = vpop.f32.mrf.mxu0  ;;  %v884_v51 = vadd.f32 %v883_v8, %v612_v38  ;;  %v872_v8 = vadd.f32 %v2302_v34, %v602_v18 }
 0x32e   : > { %v888_v33 = vadd.f32 %v887_v2, %v617_v20  ;;  %v1089_v36 = vmax.f32 %v878_v28, 0.0  ;;  %v864_v34 = vadd.f32 %v2296_v26, %v597_v6  ;;  %v854_v26 = vadd.f32 %v2284_v61, %v587_v35 }
 0x32f   : > { %v1105_v22 = vmax.f32 %v1053_v57, 0.0  ;;  %1693 = vmatprep.subr.mxu0 %v1108_v54  ;;  %v889_v59 = vpop.f32.mrf.mxu0  ;;  %v882_v57 = vadd.f32 %v881_v41, %v612_v38  ;;  %v1092_v27 = vmax.f32 %v884_v51, 0.0  ;;  %v1013_v38 = vadd.f32 %v2294_v16, %v592_v31  ;;  %v577_v16 = vpop.permute.xlu1 %576 }
 0x330   : > { %1694 = vmatpush3.msra.mxu0 %v1108_v54  ;;  %v890_v49 = vadd.f32 %v889_v59, %v617_v20  ;;  %v1093_v54 = vmax.f32 %v1033_v55, 0.0  ;;  %v1090_v59 = vmax.f32 %v1028_v39, 0.0  ;;  %v1094_v60 = vmax.f32 %v888_v33, 0.0  ;;  %v582_v20 = vpop.permute.xlu0 %581 }
 0x331   : > { %1695 = vmatprep.subr.mxu0 %v1105_v22  ;;  %v893_v3 = vpop.f32.mrf.mxu0  ;;  %v1087_v41 = vmax.f32 %v1023_v52, 0.0  ;;  %v1091_v2 = vmax.f32 %v882_v57, 0.0  ;;  %v1088_v55 = vmax.f32 %v876_v0, 0.0  ;;  %v1086_v1 = vmax.f32 %v872_v8, 0.0 }
 0x332   : > { %1696 = vmatpush3.msra.mxu0 %v1105_v22  ;;  %v894_v14 = vadd.f32 %v893_v3, %v622_v30  ;;  %v1095_v3 = vmax.f32 %v890_v49, 0.0  ;;  %v1003_v18 = vadd.f32 %v2286_v62, %v582_v20  ;;  %v998_v49 = vadd.f32 %v2274_v11, %v577_v16 }
 0x333   : > { %1697 = vmatprep.subr.mxu0 %v1102_v63  ;;  %v895_v12 = vpop.f32.mrf.mxu0  ;;  %v1082_v39 = vmax.f32 %v864_v34, 0.0  ;;  %v848_v62 = vadd.f32 %v2276_v15, %v582_v20  ;;  %v567_v11 = vpop.permute.xlu1 %566  ;;  %v1077_v51 = vmax.f32 %v854_v26, 0.0 }
 0x334   : > { %v896_v23 = vadd.f32 %v895_v12, %v622_v30  ;;  %1698 = vmatpush3.msra.mxu0 %v1102_v63  ;;  %v1097_v22 = vmax.f32 %v894_v14, 0.0  ;;  %v1018_v30 = vadd.f32 %v2290_v24, %v597_v6  ;;  %v866_v24 = vadd.f32 %v2298_v5, %v597_v6  ;;  %v572_v19 = vpop.permute.xlu0 %571 }
 0x335   : > { %1699 = vmatprep.subr.mxu0 %v1099_v10  ;;  %v858_v5 = vadd.f32 %v2288_v21, %v592_v31  ;;  %v1081_v14 = vmax.f32 %v1013_v38, 0.0  ;;  %v1085_v12 = vmax.f32 %v870_v37, 0.0  ;;  %v993_v61 = vadd.f32 %v2278_v47, %v572_v19 }
 0x336   : > { %v1098_v29 = vmax.f32 %v896_v23, 0.0  ;;  %1700 = vmatpush3.msra.mxu0 %v1099_v10  ;;  %v1084_v63 = vmax.f32 %v1018_v30, 0.0  ;;  %v860_v10 = vadd.f32 %v2292_v25, %v592_v31  ;;  %v1083_v6 = vmax.f32 %v866_v24, 0.0 }
 0x337   : > { %1701 = vmatprep.subr.mxu0 %v1096_v32  ;;  %v852_v25 = vadd.f32 %v2280_v17, %v587_v35  ;;  %v1078_v23 = vmax.f32 %v1008_v46, 0.0  ;;  %v846_v31 = vadd.f32 %v2272_v7, %v582_v20  ;;  %v1079_v33 = vmax.f32 %v858_v5, 0.0  ;;  %v1770_v5 = vld [vmem:[%s1842_s23] sm:$0xff] }
 0x338   : > { %1702 = vmatpush3.msra.mxu0 %v1096_v32  ;;  %1117 = vmatprep.subr.mxu1 %v1098_v29  ;;  %v1080_v21 = vmax.f32 %v860_v10, 0.0  ;;  %v1075_v32 = vmax.f32 %v1003_v18, 0.0  ;;  %v842_v17 = vadd.f32 %v2268_v45, %v577_v16  ;;  %v840_v29 = vadd.f32 %v2263_v58, %v577_v16  ;;  %v562_v47 = vpop.permute.xlu0 %561 }
 0x339   : > { %1703 = vmatprep.subr.mxu0 %v1093_v54  ;;  %1118 = vmatpush1.msra.mxu1 %v1097_v22  ;;  %v988_v15 = vadd.f32 %v2266_v42, %v567_v11  ;;  %v1072_v52 = vmax.f32 %v998_v49, 0.0  ;;  %v836_v7 = vadd.f32 %v2260_v56, %v572_v19  ;;  %v1074_v57 = vmax.f32 %v848_v62, 0.0  ;;  %v1771_v49 = vld [vmem:[%s1842_s23 + $0x8] sm:$0xff] }
 0x33a   : > { %1704 = vmatpush3.msra.mxu0 %v1093_v54  ;;  %1119 = vmatprep.subr.mxu1 %v1095_v3  ;;  %v1076_v54 = vmax.f32 %v852_v25, 0.0  ;;  %v834_v22 = vadd.f32 %v2258_v53, %v572_v19  ;;  %v983_v45 = vadd.f32 %v2270_v4, %v562_v47  ;;  %v1073_v35 = vmax.f32 %v846_v31, 0.0 }
 0x33b   : > { %1705 = vmatprep.subr.mxu0 %v1090_v59  ;;  %1120 = vmatpush1.msra.mxu1 %v1094_v60  ;;  %v1069_v28 = vmax.f32 %v993_v61, 0.0  ;;  %v830_v58 = vadd.f32 %v2254_v48, %v567_v11  ;;  %v1071_v42 = vmax.f32 %v842_v17, 0.0  ;;  %v828_v3 = vadd.f32 %v2252_v50, %v567_v11  ;;  %v1110_v50 = vld [vmem:[%s2441_s4 + $0x8] sm:$0xff] }
 0x33c   : > { %1706 = vmatpush3.msra.mxu0 %v1090_v59  ;;  %1121 = vmatprep.subr.mxu1 %v1092_v27  ;;  %v1070_v56 = vmax.f32 %v840_v29, 0.0  ;;  %v1066_v30 = vmax.f32 %v988_v15, 0.0  ;;  %v824_v59 = vadd.f32 %v2250_v9, %v562_v47  ;;  %v1068_v53 = vmax.f32 %v836_v7, 0.0 }
 0x33d   : > { %1707 = vmatprep.subr.mxu0 %v1087_v41  ;;  %1122 = vmatpush1.msra.mxu1 %v1091_v2  ;;  %v1067_v4 = vmax.f32 %v834_v22, 0.0  ;;  %v822_v0 = vadd.f32 %v2248_v13, %v562_v47  ;;  %v1063_v48 = vmax.f32 %v983_v45, 0.0  ;;  %v1065_v60 = vmax.f32 %v830_v58, 0.0 }
 0x33e   : > { %1708 = vmatpush3.msra.mxu0 %v1087_v41  ;;  %1123 = vmatprep.subr.mxu1 %v1089_v36  ;;  %v1064_v20 = vmax.f32 %v828_v3, 0.0  ;;  %v1062_v9 = vmax.f32 %v824_v59, 0.0  ;;  %v1302_v13 = vlaneseq  ;;  %v1300_v41 = vld [vmem:[%s2438_s1] sm:$0x7] }
 0x33f   : > { %1709 = vmatprep.subr.mxu0 %v1084_v63  ;;  %1124 = vmatpush1.msra.mxu1 %v1088_v55  ;;  %v1061_v8 = vmax.f32 %v822_v0, 0.0 }
 0x340   : > { %1710 = vmatpush3.msra.mxu0 %v1084_v63  ;;  %1125 = vmatprep.subr.mxu1 %v1086_v1  ;;  %v2336_v27 = vshrl.u32 %v1302_v13, 7 }
 0x341   : > { %1711 = vmatprep.subr.mxu0 %v1081_v14  ;;  %1126 = vmatpush1.msra.mxu1 %v1085_v12 }
 0x342   : > { %1712 = vmatpush3.msra.mxu0 %v1081_v14  ;;  %1127 = vmatprep.subr.mxu1 %v1083_v6  ;;  %v1304_v38 = vsub.s32 0, %v2336_v27  ;;  %v1312_v24 = vsub.s32 2, %v2336_v27  ;;  %v1308_v46 = vsub.s32 1, %v2336_v27 }
 0x343   : > { %1713 = vmatprep.subr.mxu0 %v1078_v23  ;;  %1128 = vmatpush1.msra.mxu1 %v1082_v39 }
 0x344   : > { %1714 = vmatpush3.msra.mxu0 %v1078_v23  ;;  %1129 = vmatprep.subr.mxu1 %v1080_v21  ;;  %v1305_v37 = vrot.slane %v1300_v41, %v1304_v38  ;;  %v1313_v34 = vrot.slane %v1300_v41, %v1312_v24  ;;  %v1309_v55 = vrot.slane %v1300_v41, %v1308_v46  ;;  %v1772_v23 = vld [vmem:[%s1842_s23 + $0x10] sm:$0xff] }
 0x345   : > { %1715 = vmatprep.subr.mxu0 %v1075_v32  ;;  %1130 = vmatpush1.msra.mxu1 %v1079_v33  ;;  %v1612_v33 = vld [vmem:[%s1842_s23 + $0x3] ss:$8 sm:$0x7] }
 0x346   : > { %1716 = vmatpush3.msra.mxu0 %v1075_v32  ;;  %1131 = vmatprep.subr.mxu1 %v1077_v51 }
 0x347   : > { %1717 = vmatprep.subr.mxu0 %v1072_v52  ;;  %1132 = vmatpush1.msra.mxu1 %v1076_v54 }
 0x348   : > { %1718 = vmatpush3.msra.mxu0 %v1072_v52  ;;  %1133 = vmatprep.subr.mxu1 %v1074_v57 }
 0x349   : > { %1719 = vmatprep.subr.mxu0 %v1069_v28  ;;  %1134 = vmatpush1.msra.mxu1 %v1073_v35 }
 0x34a   : > { %1720 = vmatpush3.msra.mxu0 %v1069_v28  ;;  %1135 = vmatprep.subr.mxu1 %v1071_v42 }
 0x34b   : > { %1721 = vmatprep.subr.mxu0 %v1066_v30  ;;  %1136 = vmatpush1.msra.mxu1 %v1070_v56 }
 0x34c   : > { %1722 = vmatpush3.msra.mxu0 %v1066_v30  ;;  %1137 = vmatprep.subr.mxu1 %v1068_v53 }
 0x34d   : > { %1723 = vmatprep.subr.mxu0 %v1063_v48  ;;  %1138 = vmatpush1.msra.mxu1 %v1067_v4 }
 0x34e   : > { %1724 = vmatpush3.msra.mxu0 %v1063_v48  ;;  %1139 = vmatprep.subr.mxu1 %v1065_v60 }
 0x34f   : > { %1726 = vmatmul.mubr.f32.vlgmr.msra.gmra.mxu0 %v1110_v50  ;;  %1140 = vmatpush1.msra.mxu1 %v1064_v20 }
 0x350   : > { %1141 = vmatprep.subr.mxu1 %v1062_v9  ;;  %1314 = vrot.lane.b32.xlu0 %v1305_v37, %s1795_s6  ;;  %v1796_v37 = vmov 1966171168  }
 0x351   : > { %1142 = vmatpush1.msra.mxu1 %v1061_v8 }
 0x352   : > { %1176 = vmatmul.mubr.f32.vlgmr.msra.gmra.mxu1 %v2245_v44 }
 0x353   : > { %1181 = vmatprep.mubr.f32.mxu1 %v1793_v40 }
 0x356   : > { %1182 = vmatmul.mubr.f32.gmra.mxu1 %v1110_v50 }
 0x3c2   : > { %v1315_v16 = vpop.permute.xlu0 %1314 }
 0x40f   : > { %v2345_v2 = vpop.f32.mrf.mxu0 }
 0x411   : > { %v1254_v44 = vpop.f32.mrf.mxu0 }
 0x412   : > { %1273 = vrot.lane.b32.xlu1 %v1254_v44, %s1795_s6  ;;  %v1177_v36 = vpop.f32.mrf.mxu1  ;;  %v1425_v44 = vunpack.c.l.s4 %v1796_v37 }
 0x414   : > { %v1179_v63 = vpop.f32.mrf.mxu1 }
 0x415   : > { %1271 = vrot.lane.b32.xlu0 %v1179_v63, %s1795_s6 }
 0x416   : > { %1269 = vrot.lane.b32.xlu1 %v1177_v36, %s1795_s6  ;;  %v1183_v60 = vpop.f32.mrf.mxu1 }
 0x418   : > { %v1185_v50 = vpop.f32.mrf.mxu1 }
 0x419   : > { %1318 = vrot.lane.b32.xlu0 %v1313_v34, %s1795_s6 }
 0x41a   : > { %1316 = vrot.lane.b32.xlu1 %v1309_v55, %s1795_s6 }
 0x484   : > { %v1274_v10 = vpop.permute.xlu1 %1273 }
 0x487   : > { %v1272_v1 = vpop.permute.xlu0 %1271 }
 0x488   : > { %v1270_v18 = vpop.permute.xlu1 %1269  ;;  %v1283_v19 = vsel %vm1281_vm10, %v1272_v1, %v1274_v10 }
 0x489   : > { %v2359_v14 = vadd.f32 %v1770_v5, %v1270_v18  ;;  %v1282_v12 = vsel %vm1281_vm10, %v1270_v18, %v1272_v1  ;;  %v2368_v39 = vadd.f32 %v1772_v23, %v1283_v19  ;;  %v1426_v1 = vunpack.c.0.s8 %v1425_v44 }
 0x48a   : > { %v2365_v25 = vadd.f32 %v1771_v49, %v1282_v12 }
 0x48b   : > { %v1325_v26 = vmul.f32 %v1315_v16, %v2359_v14  ;;  %v1319_v6 = vpop.permute.xlu0 %1318  ;;  %v1429_v49 = vsub.s32 %v1426_v1, %v2336_v27 }
 0x48c   : > { %v1317_v62 = vpop.permute.xlu1 %1316 }
 0x48d   : > { %v1320_v21 = vsel %vm1281_vm10, %v1315_v16, %v1317_v62  ;;  %1372 = vrot.lane.b32.xlu0 %v1325_v26, %s1787_s27  ;;  %1358 = vrot.lane.b32.xlu1 %v1325_v26, %s1786_s26  ;;  %v1321_v31 = vsel %vm1281_vm10, %v1317_v62, %v1319_v6 }
 0x48e   : > { %v1326_v61 = vmul.f32 %v1320_v21, %v2365_v25  ;;  %v1327_v32 = vmul.f32 %v1321_v31, %v2368_v39 }
 0x491   : > { %1360 = vrot.lane.b32.xlu0 %v1326_v61, %s1786_s26  ;;  %1362 = vrot.lane.b32.xlu1 %v1327_v32, %s1786_s26 }
 0x495   : > { %1376 = vrot.lane.b32.xlu0 %v1327_v32, %s1787_s27  ;;  %1374 = vrot.lane.b32.xlu1 %v1326_v61, %s1787_s27 }
 0x499   : > { %1329 = vrot.lane.b32.xlu1 %v1612_v33, %s1786_s26  ;;  %1335 = vrot.lane.b32.xlu0 %v1612_v33, %s1787_s27 }
 0x4ff   : > { %v1359_v11 = vpop.permute.xlu1 %1358  ;;  %v1373_v17 = vpop.permute.xlu0 %1372 }
 0x503   : > { %v1363_v51 = vpop.permute.xlu1 %1362  ;;  %v1361_v29 = vpop.permute.xlu0 %1360 }
 0x504   : > { %v1365_v15 = vsel %vm255_vm2, %v1361_v29, %v1363_v51  ;;  %v1371_v52 = vmax.f32 %v1327_v32, %v1363_v51  ;;  %v1364_v54 = vsel %vm255_vm2, %v1359_v11, %v1361_v29 }
 0x505   : > { %v1370_v7 = vmax.f32 %v1326_v61, %v1365_v15  ;;  %v1369_v58 = vmax.f32 %v1325_v26, %v1364_v54 }
 0x507   : > { %v1375_v47 = vpop.permute.xlu1 %1374  ;;  %v1377_v57 = vpop.permute.xlu0 %1376 }
 0x508   : > { %v1379_v22 = vsel %vm298_vm3, %v1375_v47, %v1377_v57  ;;  %v1385_v45 = vmax.f32 %v1371_v52, %v1377_v57  ;;  %v1378_v35 = vsel %vm298_vm3, %v1373_v17, %v1375_v47 }
 0x509   : > { %v1384_v28 = vmax.f32 %v1370_v7, %v1379_v22  ;;  %v1383_v56 = vmax.f32 %v1369_v58, %v1378_v35 }
 0x50a   : > { %1393 = vrot.lane.b32.xlu1 %v1385_v45, %s1784_s24 }
 0x50b   : > { %1391 = vrot.lane.b32.xlu0 %v1384_v28, %s1784_s24  ;;  %v1330_v42 = vpop.permute.xlu1 %1329  ;;  %v1336_v3 = vpop.permute.xlu0 %1335 }
 0x50c   : > { %v1331_v30 = vrot.slane %v1330_v42, 1  ;;  %v1337_v59 = vrot.slane %v1336_v3, 1 }
 0x50e   : > { %v1332_v53 = vsel %vm255_vm2, %v1330_v42, %v1331_v30  ;;  %1389 = vrot.lane.b32.xlu1 %v1383_v56, %s1784_s24  ;;  %v1338_v0 = vsel %vm298_vm3, %v1336_v3, %v1337_v59  ;;  %v1773_v3 = vld [vmem:[%s1842_s23 + $0x20] sm:$0xff] }
 0x50f   : > { %v1334_v4 = vmax.f32 %v1612_v33, %v1332_v53  ;;  %1403 = vrot.lane.b32.xlu0 %v1383_v56, %s1785_s25 }
 0x511   : > { %v1340_v48 = vmax.f32 %v1334_v4, %v1338_v0 }
 0x512   : > { %1405 = vrot.lane.b32.xlu1 %v1384_v28, %s1785_s25 }
 0x513   : > { %1407 = vrot.lane.b32.xlu0 %v1385_v45, %s1785_s25 }
 0x516   : > { %1342 = vrot.lane.b32.xlu1 %v1340_v48, %s1784_s24  ;;  %s1797_s24 = smov 86  }
 0x517   : > { %1348 = vrot.lane.b32.xlu0 %v1340_v48, %s1785_s25  ;;  %s1740_s25 = smul.u32 48, %s2444_s19 }
 0x519   : > { %s224_s7 = scalar_lea.vmem %s2442_s5, %s1740_s25 }
 0x51a   : > { %1275 = vrot.lane.b32.xlu1 %v1183_v60, %s1795_s6  ;;  %v1774_v60 = vld [vmem:[%s1842_s23 + $0x28] sm:$0xff] }
 0x51b   : > { %1277 = vrot.lane.b32.xlu0 %v1185_v50, %s1795_s6 }
 0x51e   : > { %1279 = vrot.lane.b32.xlu1 %v2345_v2, %s1795_s6 }
 0x57c   : > { %v1394_v20 = vpop.permute.xlu1 %1393 }
 0x57d   : > { %v1392_v9 = vpop.permute.xlu0 %1391  ;;  %v1402_v63 = vmax.f32 %v1385_v45, %v1394_v20 }
 0x57e   : > { %v1396_v36 = vsel %vm372_vm0, %v1392_v9, %v1394_v20 }
 0x57f   : > { %v1401_v16 = vmax.f32 %v1384_v28, %v1396_v36 }
 0x580   : > { %v1390_v8 = vpop.permute.xlu1 %1389 }
 0x581   : > { %v1395_v13 = vsel %vm372_vm0, %v1390_v8, %v1392_v9  ;;  %v1404_v41 = vpop.permute.xlu0 %1403 }
 0x582   : > { %v1400_v34 = vmax.f32 %v1383_v56, %v1395_v13 }
 0x584   : > { %v1406_v55 = vpop.permute.xlu1 %1405 }
 0x585   : > { %v1409_v10 = vsel %vm411_vm1, %v1404_v41, %v1406_v55  ;;  %v1408_v18 = vpop.permute.xlu0 %1407 }
 0x586   : > { %v1414_v5 = vmax.f32 %v1400_v34, %v1409_v10  ;;  %v1410_v2 = vsel %vm411_vm1, %v1406_v55, %v1408_v18  ;;  %v1416_v12 = vmax.f32 %v1402_v63, %v1408_v18 }
 0x587   : > { %v1415_v19 = vmax.f32 %v1401_v16, %v1410_v2 }
 0x588   : > { %vm1417_vm11 = vcmp.gt.f32.partialorder %v1414_v5, 0.1  ;;  %vm1419_vm12 = vcmp.gt.f32.partialorder %v1416_v12, 0.1  ;;  %v1343_v26 = vpop.permute.xlu1 %1342 }
 0x589   : > { %v1420_v6 = vsel %vm1417_vm11, 1, %v1794_v43  ;;  %vm1418_vm13 = vcmp.gt.f32.partialorder %v1415_v19, 0.1  ;;  %v1344_v23 = vrot.slane %v1343_v26, 1  ;;  %v1349_v62 = vpop.permute.xlu0 %1348  ;;  %v1422_v31 = vsel %vm1419_vm12, 1, %v1794_v43 }
 0x58a   : > { %v1421_v21 = vsel %vm1418_vm13, 1, %v1794_v43  ;;  %v1350_v61 = vrot.slane %v1349_v62, 1  ;;  %v1437_v17 = vrot.slane %v1422_v31, %v1429_v49 }
 0x58b   : > { %v1423_v32 = vcombine.low %v1420_v6, %v1421_v21  ;;  %v1345_v33 = vsel %vm372_vm0, %v1343_v26, %v1344_v23  ;;  %vm1512_vm0 = vcmask 523264  }
 0x58c   : > { %v1347_v51 = vmax.f32 %v1340_v48, %v1345_v33  ;;  %v1351_v29 = vsel %vm411_vm1, %v1349_v62, %v1350_v61  ;;  %v1276_v35 = vpop.permute.xlu1 %1275  ;;  %vm1499_vm1 = vcmask 703488  }
 0x58d   : > { %v1430_v11 = vrot.slane %v1423_v32, %v1429_v49  ;;  %v1278_v28 = vpop.permute.xlu0 %1277 }
 0x58e   : > { %v1353_v54 = vmax.f32 %v1347_v51, %v1351_v29  ;;  %v1284_v53 = vsel %vm1281_vm10, %v1276_v35, %v1278_v28 }
 0x58f   : > { %v1438_v15 = vcombine.high %v1430_v11, %v1437_v17  ;;  %v1296_v50 = vadd.f32 %v1774_v60, %v1284_v53 }
 0x590   : > { %vm1354_vm15 = vcmp.gt.f32.partialorder %v1353_v54, 0.1  ;;  %v1280_v58 = vpop.permute.xlu1 %1279 }
 0x591   : > { %v1445_v52 = vrot.slane %v1438_v15, %v1429_v49  ;;  %v1285_v4 = vsel %vm1281_vm10, %v1278_v28, %v1280_v58 }
 0x593   : > { %v1446_v7 = vcombine.high %v1445_v52, %v1445_v52 }
 0x595   : > { %vm1447_vm14 = vcmp.ne.s32.totalorder %v1446_v7, 0 }
 0x596   : > { %vm1448_vm2 = vmand %vm1354_vm15, %vm1447_vm14 }
 0x597   : > { %v1613_v47 = vsel %vm1448_vm2, 1.0, %v1793_v40  ;;  %v1295_v40 = vadd.f32 %v1773_v3, %v1276_v35 }
 0x598   : > { %v1455_v43 = vrot.slane %v1613_v47, %v1304_v38  ;;  %v1459_v57 = vrot.slane %v1613_v47, %v1308_v46  ;;  %v1463_v22 = vrot.slane %v1613_v47, %v1312_v24 }
 0x59a   : > { %1468 = vrot.lane.b32.xlu1 %v1463_v22, %s1795_s6  ;;  %v1765_v45 = vpack.i.bf16 %v1459_v57, %v1455_v43 }
 0x59c   : > { %1766 = vrot.lane.b32.xlu0 %v1765_v45, %s1795_s6 }
 0x60c   : > { %v1469_v30 = vpop.permute.xlu1 %1468 }
 0x60e   : > { %v1767_v42 = vpop.permute.xlu0 %1766 }
 0x60f   : > { %v1769_v56 = vunpack.i.h.bf16 %v1767_v42  ;;  %v1768_v38 = vunpack.i.l.bf16 %v1767_v42 }
 0x611   : > { %v1475_v46 = vmul.f32 %v1768_v38, %v2359_v14  ;;  %v1478_v27 = vmul.f32 %v1768_v38, %v1295_v40  ;;  %v1471_v24 = vsel %vm1281_vm10, %v1769_v56, %v1469_v30  ;;  %v1470_v59 = vsel %vm1281_vm10, %v1768_v38, %v1769_v56  ;;  %v1775_v14 = vld [vmem:[%s1842_s23 + $0x30] sm:$0xff] }
 0x612   : > { %v1477_v0 = vmul.f32 %v1471_v24, %v2368_v39  ;;  %v1476_v48 = vmul.f32 %v1470_v59, %v2365_v25  ;;  %v1297_v20 = vadd.f32 %v1775_v14, %v1285_v4  ;;  %v1479_v8 = vmul.f32 %v1470_v59, %v1296_v50 }
 0x613   : > { %1493 = vrot.lane.b32.xlu1 %v1478_v27, %s1797_s24  ;;  %1487 = vrot.lane.b32.xlu0 %v1475_v46, %s1797_s24 }
 0x614   : > { %v1480_v9 = vmul.f32 %v1471_v24, %v1297_v20 }
 0x617   : > { %1491 = vrot.lane.b32.xlu0 %v1477_v0, %s1797_s24  ;;  %1489 = vrot.lane.b32.xlu1 %v1476_v48, %s1797_s24 }
 0x61b   : > { %1495 = vrot.lane.b32.xlu0 %v1479_v8, %s1797_s24  ;;  %1497 = vrot.lane.b32.xlu1 %v1480_v9, %s1797_s24 }
 0x685   : > { %v1494_v13 = vpop.permute.xlu1 %1493  ;;  %v1488_v41 = vpop.permute.xlu0 %1487 }
 0x689   : > { %v1492_v25 = vpop.permute.xlu0 %1491  ;;  %v1490_v39 = vpop.permute.xlu1 %1489 }
 0x68a   : > { %1513 = vst.msk [vmem:[%s224_s7 + $0x10] sm:$0xff] %vm1512_vm0, %v1492_v25  ;;  %v1500_v37 = vsel %vm1499_vm1, %v1488_v41, %v1490_v39  ;;  %v1501_v44 = vsel %vm1499_vm1, %v1490_v39, %v1492_v25 }
 0x68b   : > { %1510 = vst [vmem:[%s224_s7] sm:$0xff] %v1500_v37  ;;  %1511 = vst [vmem:[%s224_s7 + $0x8] sm:$0xff] %v1501_v44 }
 0x68d   : > { %v1496_v36 = vpop.permute.xlu0 %1495  ;;  %v1498_v63 = vpop.permute.xlu1 %1497 }
 0x68e   : > { %v1502_v34 = vsel %vm1499_vm1, %v1494_v13, %v1496_v36  ;;  %v1503_v55 = vsel %vm1499_vm1, %v1496_v36, %v1498_v63  ;;  %1516 = vst.msk [vmem:[%s224_s7 + $0x28] sm:$0xff] %vm1512_vm0, %v1498_v63 }
 0x68f   : > { %1514 = vst [vmem:[%s224_s7 + $0x18] sm:$0xff] %v1502_v34  ;;  %1515 = vst [vmem:[%s224_s7 + $0x20] sm:$0xff] %v1503_v55 }
 0x690 PF: > { %s15_s18 = sadd.s32 1, %s1782_s18  }
 0x691   : > { %p12_p4 = scmp.ge.s32.totalorder %s15_s18, 4  }
 0x693   :  { %14 = sbr.rel (!%p12_p4) target bundleno = 1 (0x1), region = 71 }

</bundles_post_ra>
